<compile_context>
chip_gen: v7x
topology: tpu7x:2x2x1
jax: 0.10.0
libtpu: 0.0.40
codegen_flags: <defaults>
</compile_context>

<pallas_src>
import math

import jax
import jax.numpy as jnp
from jax.experimental import pallas as pl
from jax.experimental.pallas import tpu as pltpu

# ---- small config consistent with the module ----
B = 2            # batch
T = 8            # sequence length (== max_seq_length here)
IN_DIM = 21      # linear_in input features (fixed by the module: nn.Linear(21, 256))
D = 256          # model_dim (forced: linear_in outputs 256 which is added to pos emb)
H = 2            # num_heads
A = 64           # attention_dim
HA = H * A
HID = 256        # hidden_dim of the feed-forward (chosen == D so biases pack cleanly)
OUT_DIM = 16     # output_dim
NUM_BLOCKS = 2   # num_encoder_blocks
LN_EPS = 1e-5

assert HID == D, "blk_vec packing stores b1 (HID) and b2 (D) rows in one (6, D) slab"


def _layernorm(x, w, b):
    # Single-pass LayerNorm: E[x] and E[x^2] in one sweep (biased var, like torch).
    mu = jnp.mean(x, axis=-1, keepdims=True)
    ex2 = jnp.mean(x * x, axis=-1, keepdims=True)
    var = jnp.maximum(ex2 - mu * mu, 0.0)
    return (x - mu) * jax.lax.rsqrt(var + LN_EPS) * w + b


# --------------------------------------------------------------------------
# Kernel: grid=(NUM_BLOCKS,) — one encoder block per grid step, activation
# carried in VMEM scratch; embed on step 0, pool+project on the last step.
# --------------------------------------------------------------------------
def fused_transformer_kernel(x_ref, w_in_ref, pos_ref, qkv_ref, wo_ref,
                             w1_ref, w2_ref, vec_ref, w_out_ref, b_out_ref,
                             o_ref, hf_ref):
    # ---- step 0: linear_in + (pos emb + b_in); dropout == identity in eval ----
    @pl.when(pl.program_id(0) == 0)
    def _():
        h = jnp.dot(x_ref[...].astype(jnp.bfloat16), w_in_ref[...],
                    preferred_element_type=jnp.float32)          # (BT, D) f32
        hf_ref[...] = h + pos_ref[...]

    hf = hf_ref[...]                                              # (BT, D) f32
    vec = vec_ref[...]                                            # (6, D) f32
    # rows: 0 ln1w, 1 ln1b, 2 b1, 3 b2, 4 ln2w, 5 ln2b

    # ---- multi-head self-attention (fused QKV, heads batched) ----
    qkv = jnp.dot(hf.astype(jnp.bfloat16), qkv_ref[...],
                  preferred_element_type=jnp.float32)             # (BT, 3*HA)

    def to_heads(mat):                                            # (BT, HA) -> (H*B, T, A)
        return jnp.concatenate(
            [mat[:, hd * A:(hd + 1) * A].reshape(B, T, A) for hd in range(H)],
            axis=0)

    qh = to_heads(qkv[:, 0:HA]).astype(jnp.bfloat16)
    kh = to_heads(qkv[:, HA:2 * HA]).astype(jnp.bfloat16)
    vh = to_heads(qkv[:, 2 * HA:3 * HA]).astype(jnp.bfloat16)

    # scores: WQ is pre-scaled by 1/sqrt(model_dim) at init (exact power of 2)
    s = jax.lax.dot_general(qh, kh, (((2,), (2,)), ((0,), (0,))),
                            preferred_element_type=jnp.float32)   # (H*B, T, T)
    s = s - jnp.max(s, axis=-1, keepdims=True)
    p = jnp.exp(s)
    p = p * pl.reciprocal(jnp.sum(p, axis=-1, keepdims=True), approx=True)
    z = jax.lax.dot_general(p.astype(jnp.bfloat16), vh,
                            (((2,), (1,)), ((0,), (0,))),
                            preferred_element_type=jnp.float32)   # (H*B, T, A)

    # back to (BT, H*A) with head on the lane axis (matches Wo row ordering)
    zcat = jnp.concatenate(
        [z[hd * B:(hd + 1) * B].reshape(B * T, A) for hd in range(H)], axis=-1)

    attn = jnp.dot(zcat.astype(jnp.bfloat16), wo_ref[...],
                   preferred_element_type=jnp.float32)            # (BT, D)

    z1 = _layernorm(attn + hf, vec[0:1], vec[1:2])

    # ---- feed-forward ----
    ff = jnp.dot(z1.astype(jnp.bfloat16), w1_ref[...],
                 preferred_element_type=jnp.float32) + vec[2:3]
    ff = jnp.maximum(ff, 0.0)
    ff = jnp.dot(ff.astype(jnp.bfloat16), w2_ref[...],
                 preferred_element_type=jnp.float32) + vec[3:4]
    hnew = _layernorm(ff + z1, vec[4:5], vec[5:6])
    hf_ref[...] = hnew

    # ---- last step: mean pool over sequence + output projection ----
    @pl.when(pl.program_id(0) == pl.num_programs(0) - 1)
    def _():
        m = jnp.mean(hnew.reshape(B, T, D), axis=1)               # (B, D)
        o_ref[...] = jnp.dot(m.astype(jnp.bfloat16), w_out_ref[...],
                             preferred_element_type=jnp.float32) + b_out_ref[...]


# --------------------------------------------------------------------------
# pallas_call wrapper
# --------------------------------------------------------------------------
def transformer_forward(x, p):
    x2d = x.reshape(B * T, IN_DIM)        # host-side flatten; keeps slab lane-dense
    grid_spec = pltpu.PrefetchScalarGridSpec(
        num_scalar_prefetch=0,
        grid=(NUM_BLOCKS,),
        in_specs=[
            pl.BlockSpec((B * T, IN_DIM), lambda i: (0, 0)),        # x (resident)
            pl.BlockSpec((IN_DIM, D), lambda i: (0, 0)),            # w_in
            pl.BlockSpec((B * T, D), lambda i: (0, 0)),             # pos + b_in
            pl.BlockSpec((None, D, 3 * HA), lambda i: (i, 0, 0)),   # fused QKV (per block)
            pl.BlockSpec((None, HA, D), lambda i: (i, 0, 0)),       # Wo
            pl.BlockSpec((None, D, HID), lambda i: (i, 0, 0)),      # FFN w1
            pl.BlockSpec((None, HID, D), lambda i: (i, 0, 0)),      # FFN w2
            pl.BlockSpec((None, 6, D), lambda i: (i, 0, 0)),        # biases + LN vecs
            pl.BlockSpec((D, OUT_DIM), lambda i: (0, 0)),           # w_out
            pl.BlockSpec((1, OUT_DIM), lambda i: (0, 0)),           # b_out
        ],
        out_specs=pl.BlockSpec((B, OUT_DIM), lambda i: (0, 0)),
        scratch_shapes=[pltpu.VMEM((B * T, D), jnp.float32)],       # carried activation
    )
    return pl.pallas_call(
        fused_transformer_kernel,
        out_shape=jax.ShapeDtypeStruct((B, OUT_DIM), jnp.float32),
        grid_spec=grid_spec,
        compiler_params=pltpu.CompilerParams(
            dimension_semantics=("arbitrary",),       # sequential carry across blocks
            vmem_limit_bytes=32 * 1024 * 1024,
        ),
    )(x2d, p["w_in"], p["pos_bias"], p["blk_qkv"], p["blk_wo"],
      p["blk_w1"], p["blk_w2"], p["blk_vec"], p["w_out"], p["b_out"])


# --------------------------------------------------------------------------
# Pure-JAX reference (mirrors the bf16-at-matmul-boundary numerics)
# --------------------------------------------------------------------------
def reference_forward(x, p):
    def mm(a, w):
        return jnp.dot(a.astype(jnp.bfloat16), w.astype(jnp.bfloat16),
                       preferred_element_type=jnp.float32)

    h = mm(x.reshape(B * T, IN_DIM), p["w_in"]) + p["pos_bias"]
    for blk in range(NUM_BLOCKS):
        vec = p["blk_vec"][blk]
        qkv = mm(h, p["blk_qkv"][blk])
        q = qkv[:, 0:HA].reshape(B, T, H, A)
        k = qkv[:, HA:2 * HA].reshape(B, T, H, A)
        v = qkv[:, 2 * HA:3 * HA].reshape(B, T, H, A)
        s = jnp.einsum('bthd,bshd->bhts', q.astype(jnp.bfloat16),
                       k.astype(jnp.bfloat16),
                       preferred_element_type=jnp.float32)   # scale folded into WQ
        pr = jax.nn.softmax(s, axis=-1)
        z = jnp.einsum('bhts,bshd->bthd', pr.astype(jnp.bfloat16),
                       v.astype(jnp.bfloat16),
                       preferred_element_type=jnp.float32)
        attn = mm(z.reshape(B * T, H * A), p["blk_wo"][blk])
        z1 = _layernorm(attn + h, vec[0:1], vec[1:2])
        ff = jnp.maximum(mm(z1, p["blk_w1"][blk]) + vec[2:3], 0.0)
        ff = mm(ff, p["blk_w2"][blk]) + vec[3:4]
        h = _layernorm(ff + z1, vec[4:5], vec[5:6])
    m = jnp.mean(h.reshape(B, T, D), axis=1)
    return mm(m, p["w_out"]) + p["b_out"]


# --------------------------------------------------------------------------
# Deterministic parameter init (PyTorch-default-style), packed for the kernel.
# NOTE: weights are stored in bf16 — vs. a true f32 PyTorch checkpoint there is
# bf16 rounding; the self-check uses the same rounded weights in the reference.
# --------------------------------------------------------------------------
def init_params(key):
    keys = iter(jax.random.split(key, 32))

    def uni(shape, bound):
        return jax.random.uniform(next(keys), shape, jnp.float32, -bound, bound)

    def lin_w(fan_in, fan_out):                  # nn.Linear weight, pre-transposed
        return uni((fan_in, fan_out), 1.0 / math.sqrt(fan_in))

    w_in = lin_w(IN_DIM, D)
    b_in = uni((D,), 1.0 / math.sqrt(IN_DIM))
    pos = jax.random.normal(next(keys), (T, D), jnp.float32)     # nn.Embedding ~ N(0,1)
    pos_bias = jnp.tile(pos, (B, 1)) + b_in[None, :]             # b_in folded into pos

    qkv_l, wo_l, w1_l, w2_l, vec_l = [], [], [], [], []
    for _ in range(NUM_BLOCKS):
        wq = lin_w(D, HA) * (1.0 / math.sqrt(D))   # attention scale pre-folded (exact: 1/16)
        wk = lin_w(D, HA)
        wv = lin_w(D, HA)
        qkv_l.append(jnp.concatenate([wq, wk, wv], axis=1))       # (D, 3*HA)
        wo_l.append(lin_w(HA, D))
        w1_l.append(lin_w(D, HID))
        w2_l.append(lin_w(HID, D))
        b1 = uni((HID,), 1.0 / math.sqrt(D))
        b2 = uni((D,), 1.0 / math.sqrt(HID))
        vec_l.append(jnp.stack([jnp.ones((D,), jnp.float32),     # ln1 weight
                                jnp.zeros((D,), jnp.float32),    # ln1 bias
                                b1, b2,
                                jnp.ones((D,), jnp.float32),     # ln2 weight
                                jnp.zeros((D,), jnp.float32)],   # ln2 bias
                               axis=0))                           # (6, D)
    w_out = lin_w(D, OUT_DIM)
    b_out = uni((1, OUT_DIM), 1.0 / math.sqrt(D))

    return dict(
        w_in=w_in.astype(jnp.bfloat16),
        pos_bias=pos_bias,                                        # (B*T, D) f32
        blk_qkv=jnp.stack(qkv_l).astype(jnp.bfloat16),            # (NB, D, 3*HA)
        blk_wo=jnp.stack(wo_l).astype(jnp.bfloat16),              # (NB, HA, D)
        blk_w1=jnp.stack(w1_l).astype(jnp.bfloat16),              # (NB, D, HID)
        blk_w2=jnp.stack(w2_l).astype(jnp.bfloat16),              # (NB, HID, D)
        blk_vec=jnp.stack(vec_l),                                 # (NB, 6, D) f32
        w_out=w_out.astype(jnp.bfloat16),
        b_out=b_out,
    )


if __name__ == "__main__":
    key = jax.random.PRNGKey(0)
    pkey, xkey = jax.random.split(key)
    params = init_params(pkey)
    x = jax.random.normal(xkey, (B, T, IN_DIM), jnp.float32)

    out = jax.block_until_ready(transformer_forward(x, params))
    assert out.shape == (B, OUT_DIM)

    ref = reference_forward(x, params)
    max_err = float(jnp.max(jnp.abs(out - ref)))
    # tolerance covers accumulation-order + approx-reciprocal differences
    assert max_err < 1e-2, f"mismatch vs reference: {max_err}"

    # TODO(synk): nn.Dropout has no inference-time effect; implemented as identity.
    print("KERNEL_OK")
</pallas_src>

<mosaic_0001>
module attributes {stable_mosaic.version = 11 : i64} {
  func.func @fused_transformer_kernel(%arg0: i32, %arg1: memref<16x21xf32, #tpu.memory_space<vmem>>, %arg2: memref<21x256xbf16, #tpu.memory_space<vmem>>, %arg3: memref<16x256xf32, #tpu.memory_space<vmem>>, %arg4: memref<1x256x384xbf16, #tpu.memory_space<vmem>>, %arg5: memref<1x128x256xbf16, #tpu.memory_space<vmem>>, %arg6: memref<1x256x256xbf16, #tpu.memory_space<vmem>>, %arg7: memref<1x256x256xbf16, #tpu.memory_space<vmem>>, %arg8: memref<1x6x256xf32, #tpu.memory_space<vmem>>, %arg9: memref<256x16xbf16, #tpu.memory_space<vmem>>, %arg10: memref<1x16xf32, #tpu.memory_space<vmem>>, %arg11: memref<2x16xf32, #tpu.memory_space<vmem>>, %arg12: memref<16x256xf32, #tpu.memory_space<vmem>>) attributes {dimension_semantics = [#tpu.dimension_semantics<arbitrary>], iteration_bounds = array<i64: 2>, scalar_prefetch = 0 : i64, scratch_operands = 1 : i64, tpu.core_type = #tpu.core_type<tc>, window_params = [{pipeline_mode = #tpu.pipeline_mode<synchronous>, transform_indices = @transform_0, window_bounds = array<i64: 16, 21>}, {pipeline_mode = #tpu.pipeline_mode<synchronous>, transform_indices = @transform_1, window_bounds = array<i64: 21, 256>}, {pipeline_mode = #tpu.pipeline_mode<synchronous>, transform_indices = @transform_2, window_bounds = array<i64: 16, 256>}, {transform_indices = @transform_3, window_bounds = array<i64: 1, 256, 384>}, {transform_indices = @transform_4, window_bounds = array<i64: 1, 128, 256>}, {transform_indices = @transform_5, window_bounds = array<i64: 1, 256, 256>}, {transform_indices = @transform_6, window_bounds = array<i64: 1, 256, 256>}, {transform_indices = @transform_7, window_bounds = array<i64: 1, 6, 256>}, {pipeline_mode = #tpu.pipeline_mode<synchronous>, transform_indices = @transform_8, window_bounds = array<i64: 256, 16>}, {pipeline_mode = #tpu.pipeline_mode<synchronous>, transform_indices = @transform_9, window_bounds = array<i64: 1, 16>}, {pipeline_mode = #tpu.pipeline_mode<synchronous>, transform_indices = @transform_10, window_bounds = array<i64: 2, 16>}]} {
    %c0_i32 = arith.constant 0 : i32
    %0 = arith.cmpi eq, %arg0, %c0_i32 : i32
    %1 = arith.extui %0 : i1 to i32
    %c0_i32_0 = arith.constant 0 : i32
    %2 = arith.cmpi ne, %1, %c0_i32_0 : i32
    scf.if %2 {
      %c0_40 = arith.constant 0 : index
      %c0_41 = arith.constant 0 : index
      %127 = vector.load %arg1[%c0_40, %c0_41] : memref<16x21xf32, #tpu.memory_space<vmem>>, vector<16x21xf32>
      %128 = arith.truncf %127 : vector<16x21xf32> to vector<16x21xbf16>
      %c0_42 = arith.constant 0 : index
      %c0_43 = arith.constant 0 : index
      %129 = vector.load %arg2[%c0_42, %c0_43] : memref<21x256xbf16, #tpu.memory_space<vmem>>, vector<21x256xbf16>
      %cst_44 = arith.constant dense<0.000000e+00> : vector<16x256xf32>
      %130 = tpu.matmul %128, %129, %cst_44 {dimension_numbers = #tpu.dot_dimension_numbers<[1], [0], [0], [1], [0, 0, 1, 1], [], []>} : vector<16x21xbf16>, vector<21x256xbf16>, vector<16x256xf32> -> vector<16x256xf32>
      %c0_45 = arith.constant 0 : index
      %c0_46 = arith.constant 0 : index
      %131 = vector.load %arg3[%c0_45, %c0_46] : memref<16x256xf32, #tpu.memory_space<vmem>>, vector<16x256xf32>
      %132 = arith.addf %130, %131 : vector<16x256xf32>
      %c0_47 = arith.constant 0 : index
      %c0_48 = arith.constant 0 : index
      %133 = vector.load %arg12[%c0_47, %c0_48] : memref<16x256xf32, #tpu.memory_space<vmem>>, vector<16x256xf32>
      tpu.vector_store %arg12[%c0_47, %c0_48], %132 {strides = array<i32>} : memref<16x256xf32, #tpu.memory_space<vmem>>, vector<16x256xf32>,
    } else {
    }
    %c0 = arith.constant 0 : index
    %c0_1 = arith.constant 0 : index
    %3 = vector.load %arg12[%c0, %c0_1] : memref<16x256xf32, #tpu.memory_space<vmem>>, vector<16x256xf32>
    %c0_2 = arith.constant 0 : index
    %c0_3 = arith.constant 0 : index
    %c0_4 = arith.constant 0 : index
    %4 = vector.load %arg8[%c0_2, %c0_3, %c0_4] : memref<1x6x256xf32, #tpu.memory_space<vmem>>, vector<1x6x256xf32>
    %5 = vector.shape_cast %4 : vector<1x6x256xf32> to vector<6x256xf32>
    %6 = arith.truncf %3 : vector<16x256xf32> to vector<16x256xbf16>
    %c0_5 = arith.constant 0 : index
    %c0_6 = arith.constant 0 : index
    %c0_7 = arith.constant 0 : index
    %7 = vector.load %arg4[%c0_5, %c0_6, %c0_7] : memref<1x256x384xbf16, #tpu.memory_space<vmem>>, vector<1x256x384xbf16>
    %8 = vector.shape_cast %7 : vector<1x256x384xbf16> to vector<256x384xbf16>
    %cst = arith.constant dense<0.000000e+00> : vector<16x384xf32>
    %9 = tpu.matmul %6, %8, %cst {dimension_numbers = #tpu.dot_dimension_numbers<[1], [0], [0], [1], [0, 0, 1, 1], [], []>} : vector<16x256xbf16>, vector<256x384xbf16>, vector<16x384xf32> -> vector<16x384xf32>
    %10 = vector.extract_strided_slice %9 {offsets = [0, 0], sizes = [16, 128], strides = [1, 1]} : vector<16x384xf32> to vector<16x128xf32>
    %11 = vector.extract_strided_slice %10 {offsets = [0, 0], sizes = [16, 64], strides = [1, 1]} : vector<16x128xf32> to vector<16x64xf32>
    %12 = vector.shape_cast %11 : vector<16x64xf32> to vector<2x8x64xf32>
    %13 = vector.extract_strided_slice %10 {offsets = [0, 64], sizes = [16, 64], strides = [1, 1]} : vector<16x128xf32> to vector<16x64xf32>
    %14 = vector.shape_cast %13 : vector<16x64xf32> to vector<2x8x64xf32>
    %15 = tpu.concatenate %12, %14 in 0 : vector<2x8x64xf32>, vector<2x8x64xf32> -> vector<4x8x64xf32>
    %16 = arith.truncf %15 : vector<4x8x64xf32> to vector<4x8x64xbf16>
    %17 = vector.extract_strided_slice %9 {offsets = [0, 128], sizes = [16, 128], strides = [1, 1]} : vector<16x384xf32> to vector<16x128xf32>
    %18 = vector.extract_strided_slice %17 {offsets = [0, 0], sizes = [16, 64], strides = [1, 1]} : vector<16x128xf32> to vector<16x64xf32>
    %19 = vector.shape_cast %18 : vector<16x64xf32> to vector<2x8x64xf32>
    %20 = vector.extract_strided_slice %17 {offsets = [0, 64], sizes = [16, 64], strides = [1, 1]} : vector<16x128xf32> to vector<16x64xf32>
    %21 = vector.shape_cast %20 : vector<16x64xf32> to vector<2x8x64xf32>
    %22 = tpu.concatenate %19, %21 in 0 : vector<2x8x64xf32>, vector<2x8x64xf32> -> vector<4x8x64xf32>
    %23 = arith.truncf %22 : vector<4x8x64xf32> to vector<4x8x64xbf16>
    %24 = vector.extract_strided_slice %9 {offsets = [0, 256], sizes = [16, 128], strides = [1, 1]} : vector<16x384xf32> to vector<16x128xf32>
    %25 = vector.extract_strided_slice %24 {offsets = [0, 0], sizes = [16, 64], strides = [1, 1]} : vector<16x128xf32> to vector<16x64xf32>
    %26 = vector.shape_cast %25 : vector<16x64xf32> to vector<2x8x64xf32>
    %27 = vector.extract_strided_slice %24 {offsets = [0, 64], sizes = [16, 64], strides = [1, 1]} : vector<16x128xf32> to vector<16x64xf32>
    %28 = vector.shape_cast %27 : vector<16x64xf32> to vector<2x8x64xf32>
    %29 = tpu.concatenate %26, %28 in 0 : vector<2x8x64xf32>, vector<2x8x64xf32> -> vector<4x8x64xf32>
    %30 = arith.truncf %29 : vector<4x8x64xf32> to vector<4x8x64xbf16>
    %cst_8 = arith.constant dense<0.000000e+00> : vector<4x8x8xf32>
    %31 = tpu.matmul %16, %23, %cst_8 {dimension_numbers = #tpu.dot_dimension_numbers<[2], [2], [1], [1], [0, 0, 0, 1, 1, 1], [0], [0]>} : vector<4x8x64xbf16>, vector<4x8x64xbf16>, vector<4x8x8xf32> -> vector<4x8x8xf32>
    %cst_9 = arith.constant dense<0xFF800000> : vector<4x8xf32>
    %32 = vector.multi_reduction <maximumf>, %31, %cst_9 [2] : vector<4x8x8xf32> to vector<4x8xf32>
    %33 = vector.shape_cast %32 : vector<4x8xf32> to vector<4x8x1xf32>
    %34 = vector.broadcast %33 : vector<4x8x1xf32> to vector<4x8x8xf32>
    %35 = arith.subf %31, %34 : vector<4x8x8xf32>
    %36 = math.exp %35 : vector<4x8x8xf32>
    %cst_10 = arith.constant dense<0.000000e+00> : vector<4x8xf32>
    %37 = vector.multi_reduction <add>, %36, %cst_10 [2] : vector<4x8x8xf32> to vector<4x8xf32>
    %38 = vector.shape_cast %37 : vector<4x8xf32> to vector<4x8x1xf32>
    %39 = tpu.reciprocal %38 {approx = true} : vector<4x8x1xf32> -> vector<4x8x1xf32>
    %40 = vector.broadcast %39 : vector<4x8x1xf32> to vector<4x8x8xf32>
    %41 = arith.mulf %36, %40 : vector<4x8x8xf32>
    %42 = arith.truncf %41 : vector<4x8x8xf32> to vector<4x8x8xbf16>
    %cst_11 = arith.constant dense<0.000000e+00> : vector<4x8x64xf32>
    %43 = tpu.matmul %42, %30, %cst_11 {dimension_numbers = #tpu.dot_dimension_numbers<[2], [1], [1], [2], [0, 0, 0, 1, 1, 2], [0], [0]>} : vector<4x8x8xbf16>, vector<4x8x64xbf16>, vector<4x8x64xf32> -> vector<4x8x64xf32>
    %44 = vector.extract_strided_slice %43 {offsets = [0, 0, 0], sizes = [2, 8, 64], strides = [1, 1, 1]} : vector<4x8x64xf32> to vector<2x8x64xf32>
    %45 = vector.shape_cast %44 : vector<2x8x64xf32> to vector<16x64xf32>
    %46 = vector.extract_strided_slice %43 {offsets = [2, 0, 0], sizes = [2, 8, 64], strides = [1, 1, 1]} : vector<4x8x64xf32> to vector<2x8x64xf32>
    %47 = vector.shape_cast %46 : vector<2x8x64xf32> to vector<16x64xf32>
    %48 = tpu.concatenate %45, %47 in 1 : vector<16x64xf32>, vector<16x64xf32> -> vector<16x128xf32>
    %49 = arith.truncf %48 : vector<16x128xf32> to vector<16x128xbf16>
    %c0_12 = arith.constant 0 : index
    %c0_13 = arith.constant 0 : index
    %c0_14 = arith.constant 0 : index
    %50 = vector.load %arg5[%c0_12, %c0_13, %c0_14] : memref<1x128x256xbf16, #tpu.memory_space<vmem>>, vector<1x128x256xbf16>
    %51 = vector.shape_cast %50 : vector<1x128x256xbf16> to vector<128x256xbf16>
    %cst_15 = arith.constant dense<0.000000e+00> : vector<16x256xf32>
    %52 = tpu.matmul %49, %51, %cst_15 {dimension_numbers = #tpu.dot_dimension_numbers<[1], [0], [0], [1], [0, 0, 1, 1], [], []>} : vector<16x128xbf16>, vector<128x256xbf16>, vector<16x256xf32> -> vector<16x256xf32>
    %53 = arith.addf %52, %3 : vector<16x256xf32>
    %54 = vector.extract_strided_slice %5 {offsets = [0, 0], sizes = [1, 256], strides = [1, 1]} : vector<6x256xf32> to vector<1x256xf32>
    %55 = vector.extract_strided_slice %5 {offsets = [1, 0], sizes = [1, 256], strides = [1, 1]} : vector<6x256xf32> to vector<1x256xf32>
    %cst_16 = arith.constant dense<0.000000e+00> : vector<16xf32>
    %56 = vector.multi_reduction <add>, %53, %cst_16 [1] : vector<16x256xf32> to vector<16xf32>
    %57 = vector.shape_cast %56 : vector<16xf32> to vector<16x1xf32>
    %cst_17 = arith.constant 2.560000e+02 : f32
    %58 = vector.broadcast %cst_17 : f32 to vector<16x1xf32>
    %59 = arith.divf %57, %58 : vector<16x1xf32>
    %60 = arith.mulf %53, %53 : vector<16x256xf32>
    %cst_18 = arith.constant dense<0.000000e+00> : vector<16xf32>
    %61 = vector.multi_reduction <add>, %60, %cst_18 [1] : vector<16x256xf32> to vector<16xf32>
    %62 = vector.shape_cast %61 : vector<16xf32> to vector<16x1xf32>
    %cst_19 = arith.constant 2.560000e+02 : f32
    %63 = vector.broadcast %cst_19 : f32 to vector<16x1xf32>
    %64 = arith.divf %62, %63 : vector<16x1xf32>
    %65 = arith.mulf %59, %59 : vector<16x1xf32>
    %66 = arith.subf %64, %65 : vector<16x1xf32>
    %cst_20 = arith.constant 0.000000e+00 : f32
    %67 = vector.broadcast %cst_20 : f32 to vector<16x1xf32>
    %68 = arith.maximumf %66, %67 : vector<16x1xf32>
    %69 = vector.broadcast %59 : vector<16x1xf32> to vector<16x256xf32>
    %70 = arith.subf %53, %69 : vector<16x256xf32>
    %cst_21 = arith.constant 9.99999974E-6 : f32
    %71 = vector.broadcast %cst_21 : f32 to vector<16x1xf32>
    %72 = arith.addf %68, %71 : vector<16x1xf32>
    %73 = math.rsqrt %72 : vector<16x1xf32>
    %74 = vector.broadcast %73 : vector<16x1xf32> to vector<16x256xf32>
    %75 = arith.mulf %70, %74 : vector<16x256xf32>
    %76 = vector.broadcast %54 : vector<1x256xf32> to vector<16x256xf32>
    %77 = arith.mulf %75, %76 : vector<16x256xf32>
    %78 = vector.broadcast %55 : vector<1x256xf32> to vector<16x256xf32>
    %79 = arith.addf %77, %78 : vector<16x256xf32>
    %80 = arith.truncf %79 : vector<16x256xf32> to vector<16x256xbf16>
    %c0_22 = arith.constant 0 : index
    %c0_23 = arith.constant 0 : index
    %c0_24 = arith.constant 0 : index
    %81 = vector.load %arg6[%c0_22, %c0_23, %c0_24] : memref<1x256x256xbf16, #tpu.memory_space<vmem>>, vector<1x256x256xbf16>
    %82 = vector.shape_cast %81 : vector<1x256x256xbf16> to vector<256x256xbf16>
    %cst_25 = arith.constant dense<0.000000e+00> : vector<16x256xf32>
    %83 = tpu.matmul %80, %82, %cst_25 {dimension_numbers = #tpu.dot_dimension_numbers<[1], [0], [0], [1], [0, 0, 1, 1], [], []>} : vector<16x256xbf16>, vector<256x256xbf16>, vector<16x256xf32> -> vector<16x256xf32>
    %84 = vector.extract_strided_slice %5 {offsets = [2, 0], sizes = [1, 256], strides = [1, 1]} : vector<6x256xf32> to vector<1x256xf32>
    %85 = vector.broadcast %84 : vector<1x256xf32> to vector<16x256xf32>
    %86 = arith.addf %83, %85 : vector<16x256xf32>
    %cst_26 = arith.constant 0.000000e+00 : f32
    %87 = vector.broadcast %cst_26 : f32 to vector<16x256xf32>
    %88 = arith.maximumf %86, %87 : vector<16x256xf32>
    %89 = arith.truncf %88 : vector<16x256xf32> to vector<16x256xbf16>
    %c0_27 = arith.constant 0 : index
    %c0_28 = arith.constant 0 : index
    %c0_29 = arith.constant 0 : index
    %90 = vector.load %arg7[%c0_27, %c0_28, %c0_29] : memref<1x256x256xbf16, #tpu.memory_space<vmem>>, vector<1x256x256xbf16>
    %91 = vector.shape_cast %90 : vector<1x256x256xbf16> to vector<256x256xbf16>
    %cst_30 = arith.constant dense<0.000000e+00> : vector<16x256xf32>
    %92 = tpu.matmul %89, %91, %cst_30 {dimension_numbers = #tpu.dot_dimension_numbers<[1], [0], [0], [1], [0, 0, 1, 1], [], []>} : vector<16x256xbf16>, vector<256x256xbf16>, vector<16x256xf32> -> vector<16x256xf32>
    %93 = vector.extract_strided_slice %5 {offsets = [3, 0], sizes = [1, 256], strides = [1, 1]} : vector<6x256xf32> to vector<1x256xf32>
    %94 = vector.broadcast %93 : vector<1x256xf32> to vector<16x256xf32>
    %95 = arith.addf %92, %94 : vector<16x256xf32>
    %96 = arith.addf %95, %79 : vector<16x256xf32>
    %97 = vector.extract_strided_slice %5 {offsets = [4, 0], sizes = [1, 256], strides = [1, 1]} : vector<6x256xf32> to vector<1x256xf32>
    %98 = vector.extract_strided_slice %5 {offsets = [5, 0], sizes = [1, 256], strides = [1, 1]} : vector<6x256xf32> to vector<1x256xf32>
    %cst_31 = arith.constant dense<0.000000e+00> : vector<16xf32>
    %99 = vector.multi_reduction <add>, %96, %cst_31 [1] : vector<16x256xf32> to vector<16xf32>
    %100 = vector.shape_cast %99 : vector<16xf32> to vector<16x1xf32>
    %cst_32 = arith.constant 2.560000e+02 : f32
    %101 = vector.broadcast %cst_32 : f32 to vector<16x1xf32>
    %102 = arith.divf %100, %101 : vector<16x1xf32>
    %103 = arith.mulf %96, %96 : vector<16x256xf32>
    %cst_33 = arith.constant dense<0.000000e+00> : vector<16xf32>
    %104 = vector.multi_reduction <add>, %103, %cst_33 [1] : vector<16x256xf32> to vector<16xf32>
    %105 = vector.shape_cast %104 : vector<16xf32> to vector<16x1xf32>
    %cst_34 = arith.constant 2.560000e+02 : f32
    %106 = vector.broadcast %cst_34 : f32 to vector<16x1xf32>
    %107 = arith.divf %105, %106 : vector<16x1xf32>
    %108 = arith.mulf %102, %102 : vector<16x1xf32>
    %109 = arith.subf %107, %108 : vector<16x1xf32>
    %cst_35 = arith.constant 0.000000e+00 : f32
    %110 = vector.broadcast %cst_35 : f32 to vector<16x1xf32>
    %111 = arith.maximumf %109, %110 : vector<16x1xf32>
    %112 = vector.broadcast %102 : vector<16x1xf32> to vector<16x256xf32>
    %113 = arith.subf %96, %112 : vector<16x256xf32>
    %cst_36 = arith.constant 9.99999974E-6 : f32
    %114 = vector.broadcast %cst_36 : f32 to vector<16x1xf32>
    %115 = arith.addf %111, %114 : vector<16x1xf32>
    %116 = math.rsqrt %115 : vector<16x1xf32>
    %117 = vector.broadcast %116 : vector<16x1xf32> to vector<16x256xf32>
    %118 = arith.mulf %113, %117 : vector<16x256xf32>
    %119 = vector.broadcast %97 : vector<1x256xf32> to vector<16x256xf32>
    %120 = arith.mulf %118, %119 : vector<16x256xf32>
    %121 = vector.broadcast %98 : vector<1x256xf32> to vector<16x256xf32>
    %122 = arith.addf %120, %121 : vector<16x256xf32>
    %c0_37 = arith.constant 0 : index
    %c0_38 = arith.constant 0 : index
    %123 = vector.load %arg12[%c0_37, %c0_38] : memref<16x256xf32, #tpu.memory_space<vmem>>, vector<16x256xf32>
    tpu.vector_store %arg12[%c0_37, %c0_38], %122 {strides = array<i32>} : memref<16x256xf32, #tpu.memory_space<vmem>>, vector<16x256xf32>,
    %c1_i32 = arith.constant 1 : i32
    %124 = arith.cmpi eq, %arg0, %c1_i32 : i32
    %125 = arith.extui %124 : i1 to i32
    %c0_i32_39 = arith.constant 0 : i32
    %126 = arith.cmpi ne, %125, %c0_i32_39 : i32
    scf.if %126 {
      %127 = vector.shape_cast %122 : vector<16x256xf32> to vector<2x8x256xf32>
      %cst_40 = arith.constant dense<0.000000e+00> : vector<2x256xf32>
      %128 = vector.multi_reduction <add>, %127, %cst_40 [1] : vector<2x8x256xf32> to vector<2x256xf32>
      %cst_41 = arith.constant 8.000000e+00 : f32
      %129 = vector.broadcast %cst_41 : f32 to vector<2x256xf32>
      %130 = arith.divf %128, %129 : vector<2x256xf32>
      %131 = arith.truncf %130 : vector<2x256xf32> to vector<2x256xbf16>
      %c0_42 = arith.constant 0 : index
      %c0_43 = arith.constant 0 : index
      %132 = vector.load %arg9[%c0_42, %c0_43] : memref<256x16xbf16, #tpu.memory_space<vmem>>, vector<256x16xbf16>
      %cst_44 = arith.constant dense<0.000000e+00> : vector<2x16xf32>
      %133 = tpu.matmul %131, %132, %cst_44 {dimension_numbers = #tpu.dot_dimension_numbers<[1], [0], [0], [1], [0, 0, 1, 1], [], []>} : vector<2x256xbf16>, vector<256x16xbf16>, vector<2x16xf32> -> vector<2x16xf32>
      %c0_45 = arith.constant 0 : index
      %c0_46 = arith.constant 0 : index
      %134 = vector.load %arg10[%c0_45, %c0_46] : memref<1x16xf32, #tpu.memory_space<vmem>>, vector<1x16xf32>
      %135 = vector.broadcast %134 : vector<1x16xf32> to vector<2x16xf32>
      %136 = arith.addf %133, %135 : vector<2x16xf32>
      %c0_47 = arith.constant 0 : index
      %c0_48 = arith.constant 0 : index
      %137 = vector.load %arg11[%c0_47, %c0_48] : memref<2x16xf32, #tpu.memory_space<vmem>>, vector<2x16xf32>
      tpu.vector_store %arg11[%c0_47, %c0_48], %136 {strides = array<i32>} : memref<2x16xf32, #tpu.memory_space<vmem>>, vector<2x16xf32>,
    } else {
    }
    return
  }
  func.func @transform_0(%arg0: i32) -> (i32, i32) {
    %c0_i32 = arith.constant 0 : i32
    %c0_i32_0 = arith.constant 0 : i32
    %c0_i32_1 = arith.constant 0 : i32
    return %c0_i32, %c0_i32_0 : i32, i32
  }
  func.func @transform_1(%arg0: i32) -> (i32, i32) {
    %c0_i32 = arith.constant 0 : i32
    %c0_i32_0 = arith.constant 0 : i32
    %c0_i32_1 = arith.constant 0 : i32
    return %c0_i32, %c0_i32_0 : i32, i32
  }
  func.func @transform_2(%arg0: i32) -> (i32, i32) {
    %c0_i32 = arith.constant 0 : i32
    %c0_i32_0 = arith.constant 0 : i32
    %c0_i32_1 = arith.constant 0 : i32
    return %c0_i32, %c0_i32_0 : i32, i32
  }
  func.func @transform_3(%arg0: i32) -> (i32, i32, i32) {
    %c0_i32 = arith.constant 0 : i32
    %c0_i32_0 = arith.constant 0 : i32
    %c0_i32_1 = arith.constant 0 : i32
    return %arg0, %c0_i32, %c0_i32_0 : i32, i32, i32
  }
  func.func @transform_4(%arg0: i32) -> (i32, i32, i32) {
    %c0_i32 = arith.constant 0 : i32
    %c0_i32_0 = arith.constant 0 : i32
    %c0_i32_1 = arith.constant 0 : i32
    return %arg0, %c0_i32, %c0_i32_0 : i32, i32, i32
  }
  func.func @transform_5(%arg0: i32) -> (i32, i32, i32) {
    %c0_i32 = arith.constant 0 : i32
    %c0_i32_0 = arith.constant 0 : i32
    %c0_i32_1 = arith.constant 0 : i32
    return %arg0, %c0_i32, %c0_i32_0 : i32, i32, i32
  }
  func.func @transform_6(%arg0: i32) -> (i32, i32, i32) {
    %c0_i32 = arith.constant 0 : i32
    %c0_i32_0 = arith.constant 0 : i32
    %c0_i32_1 = arith.constant 0 : i32
    return %arg0, %c0_i32, %c0_i32_0 : i32, i32, i32
  }
  func.func @transform_7(%arg0: i32) -> (i32, i32, i32) {
    %c0_i32 = arith.constant 0 : i32
    %c0_i32_0 = arith.constant 0 : i32
    %c0_i32_1 = arith.constant 0 : i32
    return %arg0, %c0_i32, %c0_i32_0 : i32, i32, i32
  }
  func.func @transform_8(%arg0: i32) -> (i32, i32) {
    %c0_i32 = arith.constant 0 : i32
    %c0_i32_0 = arith.constant 0 : i32
    %c0_i32_1 = arith.constant 0 : i32
    return %c0_i32, %c0_i32_0 : i32, i32
  }
  func.func @transform_9(%arg0: i32) -> (i32, i32) {
    %c0_i32 = arith.constant 0 : i32
    %c0_i32_0 = arith.constant 0 : i32
    %c0_i32_1 = arith.constant 0 : i32
    return %c0_i32, %c0_i32_0 : i32, i32
  }
  func.func @transform_10(%arg0: i32) -> (i32, i32) {
    %c0_i32 = arith.constant 0 : i32
    %c0_i32_0 = arith.constant 0 : i32
    %c0_i32_1 = arith.constant 0 : i32
    return %c0_i32, %c0_i32_0 : i32, i32
  }
}

</mosaic_0001>

<bundles_post_ra>
// kernel: tpu_custom_call.1
= control target key start
LH: loop header
LB: loop body
LE: loop exit
PB: predicated region body
PF: predicated region fallthrough
CT: control target
= control target key end

     0   :  { %s4088_s0 = inlined_call_operand.vmem [shape: f32[16,21], index: 0, kind: input, shape index: {}]   ;;  %s4089_s1 = inlined_call_operand.vmem [shape: bf16[21,256], index: 1, kind: input, shape index: {}]   ;;  %s4090_s2 = inlined_call_operand.vmem [shape: f32[16,256], index: 2, kind: input, shape index: {}]   ;;  %s4091_s3 = inlined_call_operand.hbm [shape: bf16[2,256,384], index: 3, kind: input, shape index: {}]   ;;  %s4092_s4 = inlined_call_operand.hbm [shape: bf16[2,128,256], index: 4, kind: input, shape index: {}]   ;;  %s4093_s5 = inlined_call_operand.hbm [shape: bf16[2,256,256], index: 5, kind: input, shape index: {}]   ;;  %s4094_s6 = inlined_call_operand.hbm [shape: bf16[2,256,256], index: 6, kind: input, shape index: {}]   ;;  %s4095_s7 = inlined_call_operand.vmem [shape: f32[2,6,256], index: 7, kind: input, shape index: {}]   ;;  %s4096_s8 = inlined_call_operand.vmem [shape: bf16[256,16], index: 8, kind: input, shape index: {}]   ;;  %s4097_s9 = inlined_call_operand.vmem [shape: f32[1,16], index: 9, kind: input, shape index: {}]   ;;  %s4098_s10 = inlined_call_operand.hbm [shape: f32[2,16], index: 10, kind: output, shape index: {}]  }
   0x1   :  { %4107 = sst [smem:[#allocation19_spill]] %s4091_s3 }
   0x2   :  { %4108 = sst [smem:[#allocation20_spill]] %s4092_s4 }
   0x3   :  { %15 = vsyncpa [#allocation4], 0 }
   0x4   :  { %17 = vsyncpa [#allocation4 + $0x1], 0 }
   0x5   :  { %18 = vsyncpa [#allocation7], 0 }
   0x6   :  { %20 = vsyncpa [#allocation7 + $0x1], 0 }
   0x7   :  { %21 = vsyncpa [#allocation10], 0 }
   0x8   :  { %23 = vsyncpa [#allocation10 + $0x1], 0 }
   0x9   :  { %24 = vsyncpa [#allocation5], 0  ;;  %s3474_s13 = smov 0   ;;  %s3476_s14 = smov 0  }
   0xa   :  { %s3478_s15 = smov 0   ;;  %s3480_s16 = smov 0  }
   0xb LB: > { %4109 = sst [smem:[#allocation16_spill]] %s3398_s15  ;;  %s3493_s17 = sadd.s32 4294967295, %s3402_s16   ;;  %s3402_s16 = sphi %s3480_s16, %s4122_s16   ;;  %s3398_s15 = sphi %s3478_s15, %s4124_s15   ;;  %s3394_s14 = sphi %s3476_s14, %s4126_s14   ;;  %s3390_s13 = sphi %s3474_s13, %s4125_s13  }
   0xc   : > { %s3496_s18 = sadd.s32 1, %s3402_s16   ;;  %s100_s20 = sadd.s32 1, %s3398_s15 }
   0xd   : > { %4110 = sst [smem:[#allocation17_spill]] %s3496_s18  ;;  %s97_s19 = ssub.s32 %s3402_s16, %s3496_s18 }
   0xe   : > { %p98_p0 = scmp.eq.s32.totalorder %s97_s19, 0  ;;  %p107_p1 = scmp.ne.s32.totalorder %s3398_s15, %s3394_s14 }
   0xf   : > { %p108_p2 = scmp.eq.s32.totalorder %s3402_s16, 0  ;;  %p113_p3 = scmp.ne.s32.totalorder %s3394_s14, %s3390_s13 }
  0x10   : > { %s3506_s21 = scalar_select %p98_p0, %s3398_s15, %s100_s20  }
  0x11   : > { %p109_p4 = por %p108_p2, %p107_p1  ;;  %p114_p5 = scmp.eq.s32.totalorder %s3493_s17, 0 }
  0x12   : > { %4111 = sst [smem:[#allocation18_spill]] %s3506_s21  ;;  %p2925_p6 = scmp.lt.s32.totalorder %s3402_s16, 2 }
  0x13   : > { %p3510_p7 = por %p114_p5, %p113_p3  ;;  %s3515_s23 = sand.u32 1, %s3398_s15  }
  0x14   : > { %p3517_p8 = pnand %p2925_p6, %p109_p4  ;;  %s340_s25 = sand.u32 1, %s3402_s16  }
  0x15   : > { %s4112_s22 = scalar_select %p3510_p7, 1, 0 }
  0x16   : > { %s2606_s26 = sshll.u32 %s3515_s23, 7  ;;  %s2785_s27 = sshll.u32 %s3402_s16, 11 }
  0x17   : > { %s344_s28 = scalar_lea.vmem [#allocation6], %s2606_s26  ;;  %s4114_s4 = sld [smem:[#allocation20_spill]] }
  0x18   : > { %s351_s29 = sshll.u32 %s344_s28, 4  ;;  %s3531_s13 = scalar_lea.sflag [#allocation7], %s340_s25  ;;  %s3529_s29 = int_to_ptr.vmem [resolvable:$true] %s351_s29 }
  0x19   : > { %p3537_p10 = pneg %p3517_p8 }
  0x1d   : > { %s3527_s12 = scalar_lea.hbm %s4114_s4, %s2785_s27  ;;  %s3215_s28 = scalar_lea.hbm %s4114_s4, 4096 }
  0x1e   : > { %s3210_s19 = scalar_lea.hbm %s3527_s12, 2048  ;;  %p3216_p13 = scmp.lt.u32.totalorder %s3527_s12, %s4114_s4 }
  0x1f   : > { %p3211_p9 = scmp.ne.s32.totalorder %s3527_s12, %s3210_s19  ;;  %p3217_p0 = scmp.lt.u32.totalorder %s3215_s28, %s3210_s19 }
  0x20   : > { %p3219_p2 = scmp.lt.u32.totalorder %s3210_s19, %s3527_s12 }
  0x21   : > { %p3213_p11 = pnand %p3537_p10, %p3211_p9  ;;  %p3218_p1 = por %p3217_p0, %p3216_p13 }
  0x23   : > { %p3214_p12 = pneg %p3213_p11  ;;  %p3220_p3 = por %p3219_p2, %p3218_p1 }
  0x25   : > { %p3221_p4 = pnand %p3220_p3, %p3214_p12 }
  0x27   : > { %3224 = shalt.err (!%p3221_p4)
}
  0x28   : > { %s3225_s25 = scalar_lea.vmem %s3529_s29, 2048  ;;  %s3404_s26 = smov [#allocation6]  }
  0x29   : > { %p3226_p5 = scmp.ne.s32.totalorder %s3529_s29, %s3225_s25  ;;  %s3230_s27 = sshll.u32 %s3404_s26, 4  ;;  %s3231_s27 = int_to_ptr.vmem [resolvable:$false] %s3230_s27 }
  0x2a   : > { %s3232_s30 = scalar_lea.vmem %s3231_s27, 4096  ;;  %p3233_p11 = scmp.lt.s32.totalorder %s3529_s29, %s3231_s27 }
  0x2b   : > { %p3228_p6 = pnand %p3226_p5, %p3537_p10  ;;  %p3234_p7 = scmp.lt.s32.totalorder %s3232_s30, %s3225_s25 }
  0x2d   : > { %p3229_p9 = pneg %p3228_p6  ;;  %p3235_p13 = por %p3234_p7, %p3233_p11 }
  0x2f   : > { %p3236_p0 = pnand %p3235_p13, %p3229_p9 }
  0x31   : > { %3239 = shalt.err (!%p3236_p0)
}
  0x32   : > { %s4101_s19 = smov 128   ;;  %s4103_s28 = smov 8  }
  0x33   : > { %2918 = dma.hbm_to_vmem [thread:$0]  (!%p3517_p8), %s3527_s12, 2048, %s3529_s29, %s3531_s13, %s4101_s19, %s4101_s19, %s4103_s28  }
  0x34   : > { %p2615_p7 = scmp.ge.s32.totalorder %s3402_s16, 1  ;;  %p409_p12 = scmp.lt.s32.totalorder %s3402_s16, 3 }
  0x35   : > { %s2897_s11 = smul.u32 384, %s3515_s23  ;;  %s4117_s3 = sld [smem:[#allocation19_spill]] }
  0x36   : > { %p3567_p1 = pnand %p2615_p7, %p409_p12  ;;  %s2898_s26 = smul.u32 6144, %s3402_s16 }
  0x37   : > { %s323_s21 = scalar_lea.vmem [#allocation3], %s2897_s11  ;;  %s320_s29 = scalar_lea.sflag [#allocation4], %s3515_s23 }
  0x38   : > { %s4116_s25 = scalar_select %p3567_p1, 1, 0 }
  0x39   : > { %s330_s15 = sshll.u32 %s323_s21, 4  ;;  %s3577_s15 = int_to_ptr.vmem [resolvable:$true] %s330_s15 }
  0x3b   : > { %s3575_s4 = scalar_lea.hbm %s4117_s3, %s2898_s26  ;;  %s3245_s27 = scalar_lea.hbm %s4117_s3, 12288 }
  0x3c   : > { %s3240_s12 = scalar_lea.hbm %s3575_s4, 6144  ;;  %p3246_p5 = scmp.lt.u32.totalorder %s3575_s4, %s4117_s3 }
  0x3d   : > { %p3241_p2 = scmp.ne.s32.totalorder %s3575_s4, %s3240_s12  ;;  %p3247_p6 = scmp.lt.u32.totalorder %s3245_s27, %s3240_s12 }
  0x3e   : > { %p3249_p11 = scmp.lt.u32.totalorder %s3240_s12, %s3575_s4 }
  0x3f   : > { %p3243_p3 = pnand %p3241_p2, %p3537_p10  ;;  %p3248_p9 = por %p3247_p6, %p3246_p5 }
  0x41   : > { %p3244_p4 = pneg %p3243_p3  ;;  %p3250_p13 = por %p3249_p11, %p3248_p9 }
  0x43   : > { %p3251_p0 = pnand %p3250_p13, %p3244_p4 }
  0x45   : > { %3254 = shalt.err (!%p3251_p0)
}
  0x46   : > { %s3255_s21 = scalar_lea.vmem %s3577_s15, 6144  ;;  %s3407_s19 = smov [#allocation3]  }
  0x47   : > { %p3256_p7 = scmp.ne.s32.totalorder %s3577_s15, %s3255_s21  ;;  %s3260_s28 = sshll.u32 %s3407_s19, 4  ;;  %s3261_s28 = int_to_ptr.vmem [resolvable:$false] %s3260_s28 }
  0x48   : > { %s3262_s11 = scalar_lea.vmem %s3261_s28, 12288  ;;  %p3263_p3 = scmp.lt.s32.totalorder %s3577_s15, %s3261_s28 }
  0x49   : > { %p3258_p12 = pnand %p3256_p7, %p3537_p10  ;;  %p3264_p1 = scmp.lt.s32.totalorder %s3262_s11, %s3255_s21 }
  0x4b   : > { %p3259_p2 = pneg %p3258_p12  ;;  %p3265_p5 = por %p3264_p1, %p3263_p3 }
  0x4d   : > { %p3266_p6 = pnand %p3265_p5, %p3259_p2 }
  0x4f   : > { %3269 = shalt.err (!%p3266_p6)
}
  0x50   : > { %s3408_s12 = smov 192   ;;  %s3409_s27 = smov 12  }
  0x51   : > { %2915 = dma.hbm_to_vmem [thread:$0]  (!%p3517_p8), %s3575_s4, 6144, %s3577_s15, %s320_s29, %s3408_s12, %s3408_s12, %s3409_s27  }
  0x52   : > { %s2609_s26 = sshll.u32 %s3515_s23, 8  ;;  %s2786_s30 = sshll.u32 %s3402_s16, 12 }
  0x53   : > { %s3610_s28 = scalar_lea.hbm %s4093_s5, %s2786_s30  ;;  %s365_s11 = scalar_lea.vmem [#allocation8], %s2609_s26 }
  0x54   : > { %s372_s3 = sshll.u32 %s365_s11, 4  ;;  %s3270_s18 = scalar_lea.hbm %s3610_s28, 4096  ;;  %s3614_s3 = int_to_ptr.vmem [resolvable:$true] %s372_s3 }
  0x55   : > { %p3271_p1 = scmp.ne.s32.totalorder %s3610_s28, %s3270_s18  ;;  %s3275_s29 = scalar_lea.hbm %s4093_s5, 8192 }
  0x56   : > { %p3276_p11 = scmp.lt.u32.totalorder %s3610_s28, %s4093_s5  ;;  %p3277_p13 = scmp.lt.u32.totalorder %s3275_s29, %s3270_s18 }
  0x57   : > { %p3273_p4 = pnand %p3271_p1, %p3537_p10  ;;  %p3279_p7 = scmp.lt.u32.totalorder %s3270_s18, %s3610_s28 }
  0x58   : > { %p3278_p0 = por %p3277_p13, %p3276_p11 }
  0x59   : > { %p3274_p9 = pneg %p3273_p4 }
  0x5a   : > { %p3280_p12 = por %p3279_p7, %p3278_p0 }
  0x5c   : > { %p3281_p2 = pnand %p3280_p12, %p3274_p9 }
  0x5e   : > { %3284 = shalt.err (!%p3281_p2)
}
  0x5f   : > { %s3285_s21 = scalar_lea.vmem %s3614_s3, 4096  ;;  %s3410_s19 = smov [#allocation8]  }
  0x60   : > { %p3286_p3 = scmp.ne.s32.totalorder %s3614_s3, %s3285_s21  ;;  %s3290_s11 = sshll.u32 %s3410_s19, 4  ;;  %s3291_s11 = int_to_ptr.vmem [resolvable:$false] %s3290_s11 }
  0x61   : > { %s3292_s4 = scalar_lea.vmem %s3291_s11, 8192  ;;  %p3293_p1 = scmp.lt.s32.totalorder %s3614_s3, %s3291_s11 }
  0x62   : > { %p3288_p5 = pnand %p3286_p3, %p3537_p10  ;;  %p3294_p4 = scmp.lt.s32.totalorder %s3292_s4, %s3285_s21 }
  0x64   : > { %p3289_p6 = pneg %p3288_p5  ;;  %p3295_p11 = por %p3294_p4, %p3293_p1 }
  0x66   : > { %p3296_p13 = pnand %p3295_p11, %p3289_p6 }
  0x68   : > { %3299 = shalt.err (!%p3296_p13)
}
  0x69   : > { %s4118_s18 = smov 8   ;;  %s4119_s15 = smov 128  }
  0x6a   : > { %2921 = dma.hbm_to_vmem [thread:$0]  (!%p3517_p8), %s3610_s28, 4096, %s3614_s3, %s3531_s13, %s4119_s15, %s4119_s15, %s4118_s18  }
  0x6b   : > { %s3646_s27 = scalar_lea.hbm %s4094_s6, %s2786_s30  ;;  %s386_s21 = scalar_lea.vmem [#allocation9], %s2609_s26 }
  0x6c   : > { %s393_s19 = sshll.u32 %s386_s21, 4  ;;  %s383_s11 = scalar_lea.sflag [#allocation10], %s3515_s23  ;;  %s3650_s19 = int_to_ptr.vmem [resolvable:$true] %s393_s19 }
  0x6d   : > { %s3300_s4 = scalar_lea.hbm %s3646_s27, 4096  ;;  %s3305_s13 = scalar_lea.hbm %s4094_s6, 8192 }
  0x6e   : > { %p3301_p9 = scmp.ne.s32.totalorder %s3646_s27, %s3300_s4  ;;  %p3306_p12 = scmp.lt.u32.totalorder %s3646_s27, %s4094_s6 }
  0x6f   : > { %p3307_p2 = scmp.lt.u32.totalorder %s3305_s13, %s3300_s4  ;;  %p3309_p5 = scmp.lt.u32.totalorder %s3300_s4, %s3646_s27 }
  0x70   : > { %p3303_p0 = pnand %p3301_p9, %p3537_p10 }
  0x71   : > { %p3308_p3 = por %p3307_p2, %p3306_p12 }
  0x72   : > { %p3304_p7 = pneg %p3303_p0 }
  0x73   : > { %p3310_p6 = por %p3309_p5, %p3308_p3 }
  0x75   : > { %p3311_p1 = pnand %p3310_p6, %p3304_p7 }
  0x77   : > { %3314 = shalt.err (!%p3311_p1)
}
  0x78   : > { %s3315_s26 = scalar_lea.vmem %s3650_s19, 4096  ;;  %s3411_s29 = smov [#allocation9]  }
  0x79   : > { %p3316_p4 = scmp.ne.s32.totalorder %s3650_s19, %s3315_s26  ;;  %s3320_s12 = sshll.u32 %s3411_s29, 4  ;;  %s3321_s12 = int_to_ptr.vmem [resolvable:$false] %s3320_s12 }
  0x7a   : > { %s3322_s21 = scalar_lea.vmem %s3321_s12, 8192  ;;  %p3323_p9 = scmp.lt.s32.totalorder %s3650_s19, %s3321_s12 }
  0x7b   : > { %p3318_p11 = pnand %p3316_p4, %p3537_p10  ;;  %p3324_p0 = scmp.lt.s32.totalorder %s3322_s21, %s3315_s26 }
  0x7d   : > { %p3319_p13 = pneg %p3318_p11  ;;  %p3325_p12 = por %p3324_p0, %p3323_p9 }
  0x7f   : > { %p3326_p2 = pnand %p3325_p12, %p3319_p13 }
  0x81   : > { %3329 = shalt.err (!%p3326_p2)
}
  0x82   : > { %2924 = dma.hbm_to_vmem [thread:$0]  (!%p3517_p8), %s3646_s27, 4096, %s3650_s19, %s383_s11, %s4119_s15, %s4119_s15, %s4118_s18  }
  0x83   : > { %p4120_p10 = scmp.ne.s32.totalorder %s4116_s25, 0 }
  0x84   : > { %s415_s20 = sand.u32 (!%p4120_p10), 1, %s3394_s14   ;;  %p4121_p7 = scmp.ne.s32.totalorder (!%p4120_p10), %s4112_s22, 0 }
  0x85   : > { %413 = sbr.rel (%p4120_p10) target bundleno = 2924 (0xb6c), region = 60  ;;  %s416_s3 = scalar_lea.sflag (!%p4120_p10), [#allocation4], %s415_s20 }
  0x86   : > { %s2899_s4 = smul.u32 (!%p4120_p10), 384, %s415_s20 }
  0x88   : > { %s3682_s16 = scalar_lea.vmem (!%p4120_p10), [#allocation3], %s2899_s4 }
  0x8c   : > { %3373 = dma.done.wait (%p4121_p7), %s416_s3, 6144  }
  0x8d   : > { %3375 = vsyncadd (%p4121_p7), %s416_s3, 4294961152  ;;  %s424_s23 = sand.u32 1, %s3493_s17   ;;  %s2616_s24 = sshll.u32 %s415_s20, 7 }
  0x8e   : > { %s425_s18 = scalar_lea.sflag [#allocation7], %s424_s23  ;;  %s3689_s15 = scalar_lea.vmem [#allocation6], %s2616_s24 }
  0x8f   : > { %3377 = dma.done.wait (%p4121_p7), %s425_s18, 6144  }
  0x90   : > { %3379 = vsyncadd (%p4121_p7), %s425_s18, 4294961152  ;;  %s2617_s25 = sshll.u32 %s415_s20, 8  ;;  %s443_s19 = scalar_lea.sflag [#allocation10], %s415_s20 }
  0x91   : > { %s3695_s27 = scalar_lea.vmem [#allocation8], %s2617_s25  ;;  %s3697_s11 = scalar_lea.vmem [#allocation9], %s2617_s25 }
  0x92   : > { %3381 = dma.done.wait (%p4121_p7), %s443_s19, 4096  }
  0x93   : > { %3383 = vsyncadd (%p4121_p7), %s443_s19, 4294963200  ;;  %p498_p8 = scmp.lt.s32.totalorder %s3493_s17, 1  ;;  %p2621_p3 = scmp.ne.s32.totalorder %s3493_s17, 0 }
  0x94   : > { %v2971_v0 = vld [vmem:[%s4089_s1 + $0x4] ss:$8 sps:$4 sm:$0xff] (!%p2621_p3)   ;;  %vm537_vm0 = vcmask (!%p2621_p3), 1041408   ;;  %vm538_vm1 = vcmask (!%p2621_p3), 1042432   ;;  %v2973_v1 = vld [vmem:[%s4089_s1] ss:$8 sps:$4 sm:$0xff] (!%p2621_p3)  }
  0x95   : > { %s499_s13 = scalar_select %p498_p8, %s3493_s17, 1 }
  0x96   : > { %507 = sbr.rel (%p2621_p3) target bundleno = 377 (0x179), region = 80  ;;  %v513_v2 = vld [vmem:[%s4089_s1 + $0x10] sm:$0x77] (!%p2621_p3)  ;;  %547 = vmatprep.subr.bf16.mxu0 (!%p2621_p3), %v2971_v0  ;;  %v3412_v4 = vmov (!%p2621_p3), 65535   ;;  %v3413_v7 = vmov (!%p2621_p3), 0   ;;  %v508_v9 = vld [vmem:[%s4088_s0] sm:$0xff] (!%p2621_p3) }
  0x97   : > { %s2788_s30 = sshll.u32 %s499_s13, 4  ;;  %v2625_v3 = vcombine.high (!%p2621_p3), %v513_v2, %v513_v2  ;;  %v539_v5 = vsel (!%p2621_p3), %vm537_vm0, 4294967295, %v3412_v4  ;;  %v2624_v6 = vcombine.low (!%p2621_p3), %v513_v2, %v513_v2  ;;  %579 = vmatprep.mubr.bf16.mxu0 (!%p2621_p3), %v3413_v7  ;;  %548 = vmatpush1.bf16.msra.mxu0 (!%p2621_p3), %v2973_v1  ;;  %v509_v10 = vld [vmem:[%s4088_s0 + $0x8] sm:$0xff] (!%p2621_p3)  ;;  %vm533_vm2 = vcmask (!%p2621_p3), 171008   ;;  %v514_v14 = vld [vmem:[%s4090_s2] sm:$0xff] (!%p2621_p3)  ;;  %v516_v17 = vld [vmem:[%s4090_s2 + $0x10] sm:$0xff] (!%p2621_p3) }
  0x98   : > { %s3708_s29 = scalar_lea.vmem %s4095_s7, %s2788_s30  ;;  %v540_v8 = vsel (!%p2621_p3), %vm538_vm1, %v539_v5, 0  ;;  %v510_v13 = vpack.c.bf16 (!%p2621_p3), %v509_v10, %v508_v9  ;;  %v515_v15 = vld [vmem:[%s4090_s2 + $0x8] sm:$0xff] (!%p2621_p3)  ;;  %v517_v20 = vld [vmem:[%s4090_s2 + $0x18] sm:$0xff] (!%p2621_p3) }
  0x99   : > { %v545_v11 = vand.u32 (!%p2621_p3), %v2625_v3, %v540_v8  ;;  %v542_v12 = vand.u32 (!%p2621_p3), %v2624_v6, %v540_v8 }
  0x9b   : > { %549 = vmatprep.subr.bf16.mxu0 (!%p2621_p3), %v545_v11 }
  0x9c   : > { %550 = vmatpush1.bf16.msra.mxu0 (!%p2621_p3), %v542_v12 }
  0x9f   : > { %2626 = vmatmul.mubr.msk.bf16.vlgmr.msra.gmra.mrb[0].mxu0 %vm533_vm2, %v510_v13 }
 0x172   : > { %v581_v16 = vpop.f32.mrb[0].mxu0 }
 0x173   : > { %v582_v18 = vadd.f32 %v581_v16, %v514_v14  ;;  %v583_v19 = vpop.f32.mrb[1].mxu0 }
 0x174   : > { %v584_v21 = vadd.f32 %v583_v19, %v515_v15  ;;  %v585_v22 = vpop.f32.mrb[2].mxu0 }
 0x175   : > { %590 = vst [vmem:[#allocation2] sm:$0xff] %v582_v18  ;;  %v586_v23 = vadd.f32 %v585_v22, %v516_v17  ;;  %v587_v24 = vpop.f32.mrb[3].mxu0 }
 0x176   : > { %591 = vst [vmem:[#allocation2 + $0x8] sm:$0xff] %v584_v21  ;;  %v588_v25 = vadd.f32 %v587_v24, %v517_v20 }
 0x177   : > { %592 = vst [vmem:[#allocation2 + $0x10] sm:$0xff] %v586_v23 }
 0x178   : > { %593 = vst [vmem:[#allocation2 + $0x18] sm:$0xff] %v588_v25 }
 0x179 PF: > { %v2986_v26 = vld [vmem:[%s3682_s16 + $0x4] ss:$12 sps:$4 sm:$0xff]   ;;  %v2988_v27 = vld [vmem:[%s3682_s16] ss:$12 sps:$4 sm:$0xff]   ;;  %v2989_v28 = vld [vmem:[%s3682_s16 + $0x1c] ss:$12 sps:$4 sm:$0xff]  }
 0x17a   : > { %922 = vmatprep.subr.bf16.mxu0 %v2986_v26  ;;  %v2991_v29 = vld [vmem:[%s3682_s16 + $0x18] ss:$12 sps:$4 sm:$0xff]   ;;  %v2992_v30 = vld [vmem:[%s3682_s16 + $0x34] ss:$12 sps:$4 sm:$0xff]   ;;  %v2994_v31 = vld [vmem:[%s3682_s16 + $0x30] ss:$12 sps:$4 sm:$0xff]  }
 0x17b   : > { %923 = vmatpush1.bf16.msra.mxu0 %v2988_v27  ;;  %v2995_v32 = vld [vmem:[%s3682_s16 + $0x4c] ss:$12 sps:$4 sm:$0xff]   ;;  %v2997_v33 = vld [vmem:[%s3682_s16 + $0x48] ss:$12 sps:$4 sm:$0xff]   ;;  %v2998_v34 = vld [vmem:[%s3682_s16 + $0x64] ss:$12 sps:$4 sm:$0xff]  }
 0x17c   : > { %924 = vmatprep.subr.bf16.mxu0 %v2989_v28  ;;  %v3000_v35 = vld [vmem:[%s3682_s16 + $0x60] ss:$12 sps:$4 sm:$0xff]   ;;  %v3001_v36 = vld [vmem:[%s3682_s16 + $0x7c] ss:$12 sps:$4 sm:$0xff]   ;;  %v3003_v37 = vld [vmem:[%s3682_s16 + $0x78] ss:$12 sps:$4 sm:$0xff]  }
 0x17d   : > { %v3004_v38 = vld [vmem:[%s3682_s16 + $0x94] ss:$12 sps:$4 sm:$0xff]   ;;  %v3751_v39 = vld [vmem:[#allocation2 + $0x8] sm:$0xff]  ;;  %v3006_v41 = vld [vmem:[%s3682_s16 + $0x90] ss:$12 sps:$4 sm:$0xff]   ;;  %v3414_v16 = vmov 0.0  }
 0x17e   : > { %v3007_v42 = vld [vmem:[%s3682_s16 + $0xac] ss:$12 sps:$4 sm:$0xff]   ;;  %v3034_v44 = vld [vmem:[%s3682_s16 + $0xc8] ss:$12 sps:$4 sm:$0xff]   ;;  %v3010_v50 = vld [vmem:[%s3682_s16 + $0xc4] ss:$12 sps:$4 sm:$0xff]  }
 0x17f   : > { %925 = vmatpush1.bf16.msra.mxu0 %v2991_v29  ;;  %v3753_v40 = vld [vmem:[#allocation2 + $0x18] sm:$0xff]  ;;  %v3035_v45 = vld [vmem:[%s3682_s16 + $0x8] ss:$12 sps:$4 sm:$0xff]   ;;  %2789 = vmatprep.subr.bf16.mxu1 %v3034_v44  ;;  %v3036_v47 = vld [vmem:[%s3682_s16 + $0xe0] ss:$12 sps:$4 sm:$0xff]   ;;  %vm3415_vm3 = vmmov 0  }
 0x180   : > { %926 = vmatprep.subr.bf16.mxu0 %v2992_v30  ;;  %v601_v43 = vpack.c.bf16 %v3753_v40, %v3751_v39  ;;  %v3009_v46 = vld [vmem:[%s3682_s16 + $0xa8] ss:$12 sps:$4 sm:$0xff]   ;;  %2790 = vmatpush3.bf16.msra.mxu1 %v3035_v45  ;;  %v3037_v48 = vld [vmem:[%s3682_s16 + $0x20] ss:$12 sps:$4 sm:$0xff]   ;;  %v3038_v49 = vld [vmem:[%s3682_s16 + $0xf8] ss:$12 sps:$4 sm:$0xff]  }
 0x181   : > { %2791 = vmatprep.subr.bf16.mxu1 %v3036_v47  ;;  %v3012_v51 = vld [vmem:[%s3682_s16 + $0xc0] ss:$12 sps:$4 sm:$0xff]   ;;  %v3039_v52 = vld [vmem:[%s3682_s16 + $0x38] ss:$12 sps:$4 sm:$0xff]   ;;  %v3040_v53 = vld [vmem:[%s3682_s16 + $0x110] ss:$12 sps:$4 sm:$0xff]  }
 0x182   : > { %954 = vmatprep.mubr.bf16.mxu0 %v601_v43  ;;  %997 = vmatprep.mubr.bf16.mxu1 %v601_v43  ;;  %v3013_v54 = vld [vmem:[%s3682_s16 + $0xdc] ss:$12 sps:$4 sm:$0xff]   ;;  %v3015_v55 = vld [vmem:[%s3682_s16 + $0xd8] ss:$12 sps:$4 sm:$0xff]   ;;  %v3016_v58 = vld [vmem:[%s3682_s16 + $0xf4] ss:$12 sps:$4 sm:$0xff]  }
 0x183   : > { %927 = vmatpush1.bf16.msra.mxu0 %v2994_v31  ;;  %v3041_v56 = vld [vmem:[%s3682_s16 + $0x50] ss:$12 sps:$4 sm:$0xff]   ;;  %v3042_v57 = vld [vmem:[%s3682_s16 + $0x128] ss:$12 sps:$4 sm:$0xff]   ;;  %v3019_v61 = vld [vmem:[%s3682_s16 + $0x10c] ss:$12 sps:$4 sm:$0xff]  }
 0x184   : > { %928 = vmatprep.subr.bf16.mxu0 %v2995_v32  ;;  %2792 = vmatpush3.bf16.msra.mxu1 %v3037_v48  ;;  %v3018_v59 = vld [vmem:[%s3682_s16 + $0xf0] ss:$12 sps:$4 sm:$0xff]   ;;  %v3043_v60 = vld [vmem:[%s3682_s16 + $0x68] ss:$12 sps:$4 sm:$0xff]   ;;  %v3044_v62 = vld [vmem:[%s3682_s16 + $0x140] ss:$12 sps:$4 sm:$0xff]  }
 0x185   : > { %2793 = vmatprep.subr.bf16.mxu1 %v3038_v49  ;;  %v3045_v63 = vld [vmem:[%s3682_s16 + $0x80] ss:$12 sps:$4 sm:$0xff]   ;;  %v3021_v0 = vld [vmem:[%s3682_s16 + $0x108] ss:$12 sps:$4 sm:$0xff]   ;;  %v3046_v1 = vld [vmem:[%s3682_s16 + $0x158] ss:$12 sps:$4 sm:$0xff]  }
 0x186   : > { %v3022_v2 = vld [vmem:[%s3682_s16 + $0x124] ss:$12 sps:$4 sm:$0xff]   ;;  %v3024_v4 = vld [vmem:[%s3682_s16 + $0x120] ss:$12 sps:$4 sm:$0xff]   ;;  %v3025_v6 = vld [vmem:[%s3682_s16 + $0x13c] ss:$12 sps:$4 sm:$0xff]  }
 0x187   : > { %929 = vmatpush1.bf16.msra.mxu0 %v2997_v33  ;;  %v3047_v3 = vld [vmem:[%s3682_s16 + $0x98] ss:$12 sps:$4 sm:$0xff]   ;;  %v3048_v5 = vld [vmem:[%s3682_s16 + $0x170] ss:$12 sps:$4 sm:$0xff]   ;;  %v3028_v9 = vld [vmem:[%s3682_s16 + $0x154] ss:$12 sps:$4 sm:$0xff]  }
 0x188   : > { %930 = vmatprep.subr.bf16.mxu0 %v2998_v34  ;;  %2794 = vmatpush3.bf16.msra.mxu1 %v3039_v52  ;;  %v3049_v7 = vld [vmem:[%s3682_s16 + $0xb0] ss:$12 sps:$4 sm:$0xff]   ;;  %v3027_v8 = vld [vmem:[%s3682_s16 + $0x138] ss:$12 sps:$4 sm:$0xff]   ;;  %v3033_v15 = vld [vmem:[%s3682_s16 + $0x168] ss:$12 sps:$4 sm:$0xff]  }
 0x189   : > { %2795 = vmatprep.subr.bf16.mxu1 %v3040_v53  ;;  %v3789_v10 = vld [vmem:[#allocation2] sm:$0xff]  ;;  %v3791_v11 = vld [vmem:[#allocation2 + $0x10] sm:$0xff]  ;;  %v3031_v13 = vld [vmem:[%s3682_s16 + $0x16c] ss:$12 sps:$4 sm:$0xff]   ;;  %vm1042_vm4 = vcmask 523264   ;;  %s3416_s20 = smov 64  }
 0x18a   : > { %v3030_v12 = vld [vmem:[%s3682_s16 + $0x150] ss:$12 sps:$4 sm:$0xff]   ;;  %v600_v14 = vpack.c.bf16 %v3791_v11, %v3789_v10  ;;  %vm1279_vm5 = vcmask 1043456   ;;  %vm1227_vm6 = vcmask 64512   ;;  %p2763_p5 = scmp.ne.s32.totalorder %s3493_s17, 1 }
 0x18b   : > { %931 = vmatpush1.bf16.msra.mxu0 %v3000_v35  ;;  %vm2322_vm7 = vcmask (!%p2763_p5), 1041409   ;;  %vm2465_vm8 = vcmask (!%p2763_p5), 123904  }
 0x18c   : > { %932 = vmatprep.subr.bf16.mxu0 %v3001_v36  ;;  %2796 = vmatpush3.bf16.msra.mxu1 %v3041_v56 }
 0x18d   : > { %2797 = vmatprep.subr.bf16.mxu1 %v3042_v57 }
 0x18f   : > { %933 = vmatpush1.bf16.msra.mxu0 %v3003_v37 }
 0x190   : > { %934 = vmatprep.subr.bf16.mxu0 %v3004_v38  ;;  %2798 = vmatpush3.bf16.msra.mxu1 %v3043_v60 }
 0x191   : > { %2799 = vmatprep.subr.bf16.mxu1 %v3044_v62 }
 0x193   : > { %935 = vmatpush1.bf16.msra.mxu0 %v3006_v41 }
 0x194   : > { %936 = vmatprep.subr.bf16.mxu0 %v3007_v42  ;;  %2800 = vmatpush3.bf16.msra.mxu1 %v3045_v63 }
 0x195   : > { %2801 = vmatprep.subr.bf16.mxu1 %v3046_v1 }
 0x197   : > { %937 = vmatpush1.bf16.msra.mxu0 %v3009_v46 }
 0x198   : > { %938 = vmatprep.subr.bf16.mxu0 %v3010_v50  ;;  %2802 = vmatpush3.bf16.msra.mxu1 %v3047_v3 }
 0x199   : > { %2803 = vmatprep.subr.bf16.mxu1 %v3048_v5 }
 0x19b   : > { %939 = vmatpush1.bf16.msra.mxu0 %v3012_v51 }
 0x19c   : > { %940 = vmatprep.subr.bf16.mxu0 %v3013_v54  ;;  %2804 = vmatpush3.bf16.msra.mxu1 %v3049_v7 }
 0x19d   : > { %2849 = vmatprep.subr.bf16.mxu1 %v3414_v16 }
 0x19f   : > { %941 = vmatpush1.bf16.msra.mxu0 %v3015_v55  ;;  %998 = vmatmul.mubr.bf16.vlgmr.msra.gmra.mrb[0].mxu1 %v600_v14 }
 0x1a0   : > { %942 = vmatprep.subr.bf16.mxu0 %v3016_v58  ;;  %2851 = vmatprep.mubr.msk.bf16.mxu1 %vm3415_vm3, %v3414_v16 }
 0x1a3   : > { %943 = vmatpush1.bf16.msra.mxu0 %v3018_v59 }
 0x1a4   : > { %944 = vmatprep.subr.bf16.mxu0 %v3019_v61 }
 0x1a7   : > { %945 = vmatpush1.bf16.msra.mxu0 %v3021_v0 }
 0x1a8   : > { %946 = vmatprep.subr.bf16.mxu0 %v3022_v2 }
 0x1ab   : > { %947 = vmatpush1.bf16.msra.mxu0 %v3024_v4 }
 0x1ac   : > { %948 = vmatprep.subr.bf16.mxu0 %v3025_v6 }
 0x1af   : > { %949 = vmatpush1.bf16.msra.mxu0 %v3027_v8 }
 0x1b0   : > { %950 = vmatprep.subr.bf16.mxu0 %v3028_v9 }
 0x1b3   : > { %951 = vmatpush1.bf16.msra.mxu0 %v3030_v12 }
 0x1b4   : > { %952 = vmatprep.subr.bf16.mxu0 %v3031_v13 }
 0x1b7   : > { %953 = vmatpush1.bf16.msra.mxu0 %v3033_v15 }
 0x1ba   : > { %955 = vmatmul.mubr.bf16.vlgmr.msra.gmra.mrb[0].mxu0 %v600_v14 }
 0x272   : > { %v2805_v24 = vpop.f32.mrb[0].mxu1 }
 0x273   : > { %v2806_v26 = vpop.f32.mrb[1].mxu1 }
 0x274   : > { %v3806_v27 = vadd.f32 %v2806_v26, %v2805_v24  ;;  %v2808_v28 = vpop.f32.mrb[2].mxu1 }
 0x275   : > { %v2809_v30 = vpop.f32.mrb[3].mxu1 }
 0x276   : > { %v3808_v31 = vadd.f32 %v2809_v30, %v2808_v28  ;;  %v1038_v45 = vpack.c.bf16 %v3806_v27, %v3806_v27 }
 0x278   : > { %v1281_v48 = vsel %vm1279_vm5, %v1038_v45, 0 }
 0x28d   : > { %v956_v17 = vpop.f32.mrb[0].mxu0 }
 0x28e   : > { %v958_v18 = vpop.f32.mrb[1].mxu0  ;;  %v1014_v29 = vpack.c.bf16 %v956_v17, %v956_v17 }
 0x28f   : > { %v1026_v19 = vpack.c.bf16 %v958_v18, %v958_v18  ;;  %1020 = vrot.lane.b32.xlu0 %v958_v18, %s3416_s20  ;;  %v960_v20 = vpop.f32.mrb[2].mxu0 }
 0x290   : > { %1010 = vrot.lane.b32.xlu1 %v960_v20, %s3416_s20  ;;  %v962_v21 = vpop.f32.mrb[3].mxu0  ;;  %v1015_v33 = vpack.c.bf16 %v960_v20, %v960_v20 }
 0x291   : > { %v2976_v22 = vpack.i.bf16 %v962_v21, %v956_v17  ;;  %v1047_v23 = vsel %vm1042_vm4, %v1026_v19, 0  ;;  %v1027_v25 = vpack.c.bf16 %v962_v21, %v962_v21 }
 0x292   : > { %2850 = vmatpush3.bf16.xpose.msra.mxu1 %v1047_v23 }
 0x293   : > { %2977 = vrot.lane.b32.xlu0 %v2976_v22, %s3416_s20  ;;  %2855 = vmatprep.subr.bf16.mxu1 %v3414_v16  ;;  %v1093_v32 = vsel %vm1042_vm4, %v1027_v25, 0 }
 0x299   : > { %2852 = vmatmul.mubr.msk.bf16.vlgmr.msra.gmra.mrb[4].mxu1 %vm1042_vm4, %v1014_v29 }
 0x29a   : > { %2856 = vmatpush3.bf16.xpose.msra.mxu1 %v1093_v32  ;;  %2857 = vmatprep.mubr.msk.bf16.mxu1 %vm3415_vm3, %v3414_v16 }
 0x29b   : > { %2861 = vmatprep.subr.bf16.mxu1 %v3414_v16 }
 0x2a1   : > { %2858 = vmatmul.mubr.msk.bf16.vlgmr.msra.gmra.mrb[8].mxu1 %vm1042_vm4, %v1015_v33  ;;  %v1039_v33 = vpack.c.bf16 %v3808_v31, %v3808_v31 }
 0x2a2   : > { %2863 = vmatprep.mubr.msk.bf16.mxu1 %vm3415_vm3, %v3414_v16 }
 0x301   : > { %v1021_v34 = vpop.permute.xlu0 %1020 }
 0x302   : > { %v1028_v35 = vpack.c.bf16 %v1021_v34, %v1021_v34  ;;  %v1011_v46 = vpop.permute.xlu1 %1010 }
 0x303   : > { %v1017_v47 = vpack.c.bf16 %v1011_v46, %v1011_v46 }
 0x304   : > { %v1139_v36 = vsel %vm1042_vm4, %v1028_v35, 0 }
 0x305   : > { %v2978_v37 = vpop.permute.xlu0 %2977  ;;  %2862 = vmatpush3.bf16.xpose.msra.mxu1 %v1139_v36  ;;  %v1327_v36 = vsel %vm1279_vm5, %v1039_v33, 0 }
 0x306   : > { %v2980_v38 = vunpack.i.h.bf16 %v2978_v37  ;;  %v2979_v41 = vunpack.i.l.bf16 %v2978_v37  ;;  %2867 = vmatprep.subr.bf16.mxu1 %v3414_v16 }
 0x308   : > { %v1029_v42 = vpack.c.bf16 %v2980_v38, %v2980_v38  ;;  %v1016_v43 = vpack.c.bf16 %v2979_v41, %v2979_v41 }
 0x30a   : > { %v1185_v44 = vsel %vm1042_vm4, %v1029_v42, 0 }
 0x30c   : > { %2864 = vmatmul.mubr.msk.bf16.vlgmr.msra.gmra.mrb[12].mxu1 %vm1042_vm4, %v1016_v43 }
 0x30d   : > { %2868 = vmatpush3.bf16.xpose.msra.mxu1 %v1185_v44  ;;  %2869 = vmatprep.mubr.msk.bf16.mxu1 %vm3415_vm3, %v3414_v16 }
 0x30e   : > { %2873 = vmatprep.subr.bf16.mxu1 %v3414_v16 }
 0x314   : > { %2870 = vmatmul.mubr.msk.bf16.vlgmr.msra.gmra.mrb[16].mxu1 %vm1042_vm4, %v1017_v47 }
 0x315   : > { %2874 = vmatpush3.bf16.msra.mxu1 %v1281_v48  ;;  %2875 = vmatprep.mubr.msk.bf16.mxu1 %vm3415_vm3, %v3414_v16 }
 0x316   : > { %2879 = vmatprep.subr.bf16.mxu1 %v3414_v16 }
 0x36c   : > { %v1083_v49 = vpop.f32.mrb[4].mxu1 }
 0x36d   : > { %v2853_v50 = vpop.f32.mrb[5].mxu1  ;;  %v1228_v51 = vsel %vm1227_vm6, %v1083_v49, -inf }
 0x36e   : > { %v1086_v52 = vpop.f32.mrb[6].mxu1  ;;  %1229 = vmax.xlane.f32.xlu1 %v1228_v51 }
 0x36f   : > { %v2854_v53 = vpop.f32.mrb[7].mxu1 }
 0x374   : > { %v1129_v54 = vpop.f32.mrb[8].mxu1 }
 0x375   : > { %v2859_v55 = vpop.f32.mrb[9].mxu1  ;;  %v1231_v56 = vsel %vm1227_vm6, %v1129_v54, -inf }
 0x376   : > { %1232 = vmax.xlane.f32.xlu0 %v1231_v56  ;;  %v1132_v57 = vpop.f32.mrb[10].mxu1  ;;  %v3052_v55 = vld [vmem:[%s3689_s15 + $0x4] ss:$8 sps:$4 sm:$0xff]   ;;  %v3055_v56 = vld [vmem:[%s3689_s15 + $0x14] ss:$8 sps:$4 sm:$0xff]  }
 0x377   : > { %v2860_v58 = vpop.f32.mrb[11].mxu1  ;;  %1568 = vmatprep.subr.bf16.mxu0 %v3052_v55 }
 0x3df   : > { %v1175_v59 = vpop.f32.mrb[12].mxu1 }
 0x3e0   : > { %v2865_v60 = vpop.f32.mrb[13].mxu1  ;;  %v1234_v61 = vsel %vm1227_vm6, %v1175_v59, -inf }
 0x3e1   : > { %1235 = vmax.xlane.f32.xlu0 %v1234_v61  ;;  %v1178_v62 = vpop.f32.mrb[14].mxu1 }
 0x3e2   : > { %v2866_v63 = vpop.f32.mrb[15].mxu1  ;;  %v3056_v62 = vld [vmem:[%s3689_s15 + $0x20] ss:$8 sps:$4 sm:$0xff]  }
 0x3e3   : > { %v3061_v63 = vld [vmem:[%s3689_s15 + $0x34] ss:$8 sps:$4 sm:$0xff]  }
 0x3e7   : > { %v1221_v0 = vpop.f32.mrb[16].mxu1 }
 0x3e8   : > { %v2871_v1 = vpop.f32.mrb[17].mxu1  ;;  %v1237_v2 = vsel %vm1227_vm6, %v1221_v0, -inf }
 0x3e9   : > { %1238 = vmax.xlane.f32.xlu1 %v1237_v2  ;;  %v1224_v3 = vpop.f32.mrb[18].mxu1  ;;  %v3059_v2 = vld [vmem:[%s3689_s15 + $0x30] ss:$8 sps:$4 sm:$0xff]  }
 0x3ea   : > { %v2872_v4 = vpop.f32.mrb[19].mxu1 }
 0x3eb   : > { %v3064_v4 = vld [vmem:[%s3689_s15 + $0x44] ss:$8 sps:$4 sm:$0xff]  }
 0x3fb   : > { %v1230_v5 = vpop.xlane.xlu1 %1229 }
 0x3fc   : > { %v1240_v6 = vsub.f32 %v1083_v49, %v1230_v5 }
 0x3fe   : > { %v1244_v7 = vmul.f32 1.442695, %v1240_v6  ;;  %v3062_v6 = vld [vmem:[%s3689_s15 + $0x40] ss:$8 sps:$4 sm:$0xff]  }
 0x400   : > { %3170 = vpow2.f32 %v1244_v7  ;;  %v3067_v7 = vld [vmem:[%s3689_s15 + $0x54] ss:$8 sps:$4 sm:$0xff]  }
 0x403   : > { %v1233_v8 = vpop.xlane.xlu0 %1232 }
 0x404   : > { %v1241_v9 = vsub.f32 %v1129_v54, %v1233_v8  ;;  %v3050_v54 = vld [vmem:[%s3689_s15] ss:$8 sps:$4 sm:$0xff]   ;;  %v3065_v8 = vld [vmem:[%s3689_s15 + $0x50] ss:$8 sps:$4 sm:$0xff]  }
 0x405   : > { %1569 = vmatpush1.bf16.msra.mxu0 %v3050_v54 }
 0x406   : > { %v1246_v12 = vmul.f32 1.442695, %v1241_v9  ;;  %1570 = vmatprep.subr.bf16.mxu0 %v3055_v56  ;;  %v3070_v9 = vld [vmem:[%s3689_s15 + $0x64] ss:$8 sps:$4 sm:$0xff]  }
 0x408   : > { %3172 = vpow2.f32 %v1246_v12  ;;  %v3068_v12 = vld [vmem:[%s3689_s15 + $0x60] ss:$8 sps:$4 sm:$0xff]  }
 0x40a   : > { %v3171_v13 = vpop.eup %3170 }
 0x40b   : > { %v1252_v14 = vsel %vm1227_vm6, %v3171_v13, 0.0 }
 0x40c   : > { %1253 = vadd.xlane.f32.xlu0 %v1252_v14  ;;  %v3071_v14 = vld [vmem:[%s3689_s15 + $0x70] ss:$8 sps:$4 sm:$0xff]  }
 0x412   : > { %v3173_v15 = vpop.eup %3172 }
 0x413   : > { %v1255_v17 = vsel %vm1227_vm6, %v3173_v15, 0.0 }
 0x414   : > { %1256 = vadd.xlane.f32.xlu1 %v1255_v17 }
 0x46e   : > { %v1236_v18 = vpop.xlane.xlu0 %1235 }
 0x46f   : > { %v1242_v19 = vsub.f32 %v1175_v59, %v1236_v18  ;;  %v3053_v59 = vld [vmem:[%s3689_s15 + $0x10] ss:$8 sps:$4 sm:$0xff]  }
 0x470   : > { %1571 = vmatpush1.bf16.msra.mxu0 %v3053_v59 }
 0x471   : > { %v1248_v20 = vmul.f32 1.442695, %v1242_v19  ;;  %v3417_v19 = vmov 0  }
 0x472   : > { %1600 = vmatprep.mubr.bf16.mxu0 %v3417_v19  ;;  %v3125_v19 = vld [vmem:[%s3697_s11 + $0x10] ss:$8 sps:$4 sm:$0xff]  }
 0x473   : > { %3174 = vpow2.f32 %v1248_v20 }
 0x476   : > { %v1239_v21 = vpop.xlane.xlu1 %1238 }
 0x477   : > { %v1243_v22 = vsub.f32 %v1221_v0, %v1239_v21 }
 0x479   : > { %v1250_v23 = vmul.f32 1.442695, %v1243_v22 }
 0x47b   : > { %3176 = vpow2.f32 %v1250_v23 }
 0x47d   : > { %v3175_v24 = vpop.eup %3174 }
 0x47e   : > { %v1258_v25 = vsel %vm1227_vm6, %v3175_v24, 0.0 }
 0x47f   : > { %1259 = vadd.xlane.f32.xlu0 %v1258_v25 }
 0x485   : > { %v3177_v26 = vpop.eup %3176 }
 0x486   : > { %v1261_v28 = vsel %vm1227_vm6, %v3177_v26, 0.0 }
 0x487   : > { %1262 = vadd.xlane.f32.xlu1 %v1261_v28 }
 0x495   : > { %1032 = vrot.lane.b32.xlu0 %v3806_v27, %s3416_s20 }
 0x498   : > { %1034 = vrot.lane.b32.xlu1 %v3808_v31, %s3416_s20 }
 0x499   : > { %v1254_v29 = vpop.xlane.xlu0 %1253 }
 0x49a   : > { %3178 = vrcp.f32 %v1254_v29 }
 0x4a1   : > { %v1257_v30 = vpop.xlane.xlu1 %1256 }
 0x4a2   : > { %3180 = vrcp.f32 %v1257_v30 }
 0x4a4   : > { %v3179_v32 = vpop.eup %3178 }
 0x4a5   : > { %v1268_v34 = vmul.f32 %v3179_v32, %v3171_v13  ;;  %v3073_v13 = vld [vmem:[%s3689_s15 + $0x74] ss:$8 sps:$4 sm:$0xff]  }
 0x4a7   : > { %v1272_v35 = vpack.c.bf16 %v1268_v34, %v1268_v34  ;;  %v3074_v34 = vld [vmem:[%s3695_s27] ss:$8 sps:$4 sm:$0xff]  }
 0x4a9   : > { %2876 = vmatmul.mubr.msk.bf16.vlgmr.msra.gmra.mrb[20].mxu1 %vm1227_vm6, %v1272_v35  ;;  %v3076_v35 = vld [vmem:[%s3695_s27 + $0x4] ss:$8 sps:$4 sm:$0xff]  }
 0x4aa   : > { %2880 = vmatpush3.bf16.msra.mxu1 %v1327_v36  ;;  %2881 = vmatprep.mubr.msk.bf16.mxu1 %vm3415_vm3, %v3414_v16  ;;  %v3079_v36 = vld [vmem:[%s3695_s27 + $0x14] ss:$8 sps:$4 sm:$0xff]  }
 0x4ab   : > { %2885 = vmatprep.subr.bf16.mxu1 %v3414_v16 }
 0x4ac   : > { %v3181_v27 = vpop.eup %3180 }
 0x4ad   : > { %v1269_v37 = vmul.f32 %v3181_v27, %v3173_v15  ;;  %v3077_v27 = vld [vmem:[%s3695_s27 + $0x10] ss:$8 sps:$4 sm:$0xff]  }
 0x4af   : > { %v1273_v38 = vpack.c.bf16 %v1269_v37, %v1269_v37  ;;  %v3082_v37 = vld [vmem:[%s3695_s27 + $0x24] ss:$8 sps:$4 sm:$0xff]  }
 0x4b1   : > { %2882 = vmatmul.mubr.msk.bf16.vlgmr.msra.gmra.mrb[24].mxu1 %vm1227_vm6, %v1273_v38  ;;  %v3080_v38 = vld [vmem:[%s3695_s27 + $0x20] ss:$8 sps:$4 sm:$0xff]  }
 0x4b2   : > { %2887 = vmatprep.mubr.msk.bf16.mxu1 %vm3415_vm3, %v3414_v16 }
 0x50c   : > { %v1260_v31 = vpop.xlane.xlu0 %1259 }
 0x50d   : > { %3182 = vrcp.f32 %v1260_v31  ;;  %v3085_v31 = vld [vmem:[%s3695_s27 + $0x34] ss:$8 sps:$4 sm:$0xff]  }
 0x510   : > { %v1033_v41 = vpop.permute.xlu0 %1032 }
 0x511   : > { %v1040_v42 = vpack.c.bf16 %v1033_v41, %v1033_v41  ;;  %v3083_v41 = vld [vmem:[%s3695_s27 + $0x30] ss:$8 sps:$4 sm:$0xff]  }
 0x513   : > { %v1373_v43 = vsel %vm1279_vm5, %v1040_v42, 0  ;;  %v3088_v42 = vld [vmem:[%s3695_s27 + $0x44] ss:$8 sps:$4 sm:$0xff]  }
 0x514   : > { %2886 = vmatpush3.bf16.msra.mxu1 %v1373_v43  ;;  %v1263_v44 = vpop.xlane.xlu1 %1262  ;;  %v3086_v43 = vld [vmem:[%s3695_s27 + $0x40] ss:$8 sps:$4 sm:$0xff]  }
 0x515   : > { %3184 = vrcp.f32 %v1263_v44  ;;  %2891 = vmatprep.subr.bf16.mxu1 %v3414_v16  ;;  %v3091_v44 = vld [vmem:[%s3695_s27 + $0x54] ss:$8 sps:$4 sm:$0xff]  }
 0x517   : > { %v3183_v45 = vpop.eup %3182 }
 0x518   : > { %v1270_v46 = vmul.f32 %v3183_v45, %v3175_v24  ;;  %v1035_v47 = vpop.permute.xlu1 %1034  ;;  %v3089_v45 = vld [vmem:[%s3695_s27 + $0x50] ss:$8 sps:$4 sm:$0xff]  }
 0x519   : > { %v1041_v48 = vpack.c.bf16 %v1035_v47, %v1035_v47  ;;  %v3092_v47 = vld [vmem:[%s3695_s27 + $0x60] ss:$8 sps:$4 sm:$0xff]  }
 0x51a   : > { %v1274_v49 = vpack.c.bf16 %v1270_v46, %v1270_v46  ;;  %v3094_v46 = vld [vmem:[%s3695_s27 + $0x64] ss:$8 sps:$4 sm:$0xff]  }
 0x51b   : > { %v1419_v50 = vsel %vm1279_vm5, %v1041_v48, 0 }
 0x51c   : > { %2888 = vmatmul.mubr.msk.bf16.vlgmr.msra.gmra.mrb[28].mxu1 %vm1227_vm6, %v1274_v49 }
 0x51d   : > { %2892 = vmatpush3.bf16.msra.mxu1 %v1419_v50  ;;  %2893 = vmatprep.mubr.msk.bf16.mxu1 %vm3415_vm3, %v3414_v16  ;;  %v3058_v16 = vld [vmem:[%s3689_s15 + $0x24] ss:$8 sps:$4 sm:$0xff]  }
 0x51e   : > { %1572 = vmatprep.subr.bf16.mxu0 %v3058_v16  ;;  %1876 = vmatprep.subr.bf16.mxu1 %v3076_v35  ;;  %v3095_v16 = vld [vmem:[%s3695_s27 + $0x70] ss:$8 sps:$4 sm:$0xff]   ;;  %v3146_v35 = vld [vmem:[%s3697_s11 + $0x80] ss:$8 sps:$4 sm:$0xff]  }
 0x51f   : > { %v3185_v51 = vpop.eup %3184  ;;  %1573 = vmatpush1.bf16.msra.mxu0 %v3056_v62  ;;  %v3098_v62 = vld [vmem:[%s3695_s27 + $0x80] ss:$8 sps:$4 sm:$0xff]  }
 0x520   : > { %v1271_v52 = vmul.f32 %v3185_v51, %v3177_v26  ;;  %1574 = vmatprep.subr.bf16.mxu0 %v3061_v63  ;;  %v3103_v63 = vld [vmem:[%s3695_s27 + $0x94] ss:$8 sps:$4 sm:$0xff]  }
 0x522   : > { %v1275_v53 = vpack.c.bf16 %v1271_v52, %v1271_v52 }
 0x523   : > { %1575 = vmatpush1.bf16.msra.mxu0 %v3059_v2  ;;  %v3104_v2 = vld [vmem:[%s3695_s27 + $0xa0] ss:$8 sps:$4 sm:$0xff]  }
 0x524   : > { %2894 = vmatmul.mubr.msk.bf16.vlgmr.msra.gmra.mrb[32].mxu1 %vm1227_vm6, %v1275_v53  ;;  %1576 = vmatprep.subr.bf16.mxu0 %v3064_v4  ;;  %v3107_v4 = vld [vmem:[%s3695_s27 + $0xb0] ss:$8 sps:$4 sm:$0xff]  }
 0x525   : > { %1877 = vmatpush1.bf16.msra.mxu1 %v3074_v34  ;;  %v3148_v34 = vld [vmem:[%s3697_s11 + $0x84] ss:$8 sps:$4 sm:$0xff]  }
 0x526   : > { %1878 = vmatprep.subr.bf16.mxu1 %v3079_v36  ;;  %v3151_v36 = vld [vmem:[%s3697_s11 + $0x94] ss:$8 sps:$4 sm:$0xff]  }
 0x527   : > { %1577 = vmatpush1.bf16.msra.mxu0 %v3062_v6  ;;  %v3110_v6 = vld [vmem:[%s3695_s27 + $0xc0] ss:$8 sps:$4 sm:$0xff]  }
 0x528   : > { %1578 = vmatprep.subr.bf16.mxu0 %v3067_v7  ;;  %v3115_v7 = vld [vmem:[%s3695_s27 + $0xd4] ss:$8 sps:$4 sm:$0xff]  }
 0x529   : > { %1879 = vmatpush1.bf16.msra.mxu1 %v3077_v27  ;;  %v3149_v27 = vld [vmem:[%s3697_s11 + $0x90] ss:$8 sps:$4 sm:$0xff]  }
 0x52a   : > { %1880 = vmatprep.subr.bf16.mxu1 %v3082_v37  ;;  %v3154_v37 = vld [vmem:[%s3697_s11 + $0xa4] ss:$8 sps:$4 sm:$0xff]  }
 0x52b   : > { %1579 = vmatpush1.bf16.msra.mxu0 %v3065_v8  ;;  %v3113_v8 = vld [vmem:[%s3695_s27 + $0xd0] ss:$8 sps:$4 sm:$0xff]  }
 0x52c   : > { %1580 = vmatprep.subr.bf16.mxu0 %v3070_v9  ;;  %v3118_v9 = vld [vmem:[%s3695_s27 + $0xe4] ss:$8 sps:$4 sm:$0xff]  }
 0x52d   : > { %1881 = vmatpush1.bf16.msra.mxu1 %v3080_v38  ;;  %v3152_v38 = vld [vmem:[%s3697_s11 + $0xa0] ss:$8 sps:$4 sm:$0xff]  }
 0x52e   : > { %1882 = vmatprep.subr.bf16.mxu1 %v3085_v31  ;;  %v3157_v31 = vld [vmem:[%s3697_s11 + $0xb4] ss:$8 sps:$4 sm:$0xff]  }
 0x52f   : > { %1581 = vmatpush1.bf16.msra.mxu0 %v3068_v12  ;;  %v3116_v12 = vld [vmem:[%s3695_s27 + $0xe0] ss:$8 sps:$4 sm:$0xff]  }
 0x530   : > { %1582 = vmatprep.subr.bf16.mxu0 %v3073_v13  ;;  %v3121_v13 = vld [vmem:[%s3695_s27 + $0xf4] ss:$8 sps:$4 sm:$0xff]  }
 0x531   : > { %1883 = vmatpush1.bf16.msra.mxu1 %v3083_v41  ;;  %v3155_v41 = vld [vmem:[%s3697_s11 + $0xb0] ss:$8 sps:$4 sm:$0xff]  }
 0x532   : > { %1884 = vmatprep.subr.bf16.mxu1 %v3088_v42  ;;  %v3160_v42 = vld [vmem:[%s3697_s11 + $0xc4] ss:$8 sps:$4 sm:$0xff]  }
 0x533   : > { %1583 = vmatpush1.bf16.msra.mxu0 %v3071_v14  ;;  %v3119_v14 = vld [vmem:[%s3695_s27 + $0xf0] ss:$8 sps:$4 sm:$0xff]  }
 0x535   : > { %1885 = vmatpush1.bf16.msra.mxu1 %v3086_v43  ;;  %v3158_v43 = vld [vmem:[%s3697_s11 + $0xc0] ss:$8 sps:$4 sm:$0xff]  }
 0x536   : > { %1886 = vmatprep.subr.bf16.mxu1 %v3091_v44  ;;  %v3163_v44 = vld [vmem:[%s3697_s11 + $0xd4] ss:$8 sps:$4 sm:$0xff]  }
 0x539   : > { %1887 = vmatpush1.bf16.msra.mxu1 %v3089_v45  ;;  %v3161_v45 = vld [vmem:[%s3697_s11 + $0xd0] ss:$8 sps:$4 sm:$0xff]  }
 0x53a   : > { %1888 = vmatprep.subr.bf16.mxu1 %v3094_v46 }
 0x53d   : > { %1889 = vmatpush1.bf16.msra.mxu1 %v3092_v47 }
 0x57c   : > { %v1317_v57 = vpop.f32.mrb[20].mxu1 }
 0x57d   : > { %v2877_v58 = vpop.f32.mrb[21].mxu1 }
 0x57e   : > { %v1320_v60 = vpop.f32.mrb[22].mxu1 }
 0x57f   : > { %v2878_v61 = vpop.f32.mrb[23].mxu1  ;;  %v3097_v60 = vld [vmem:[%s3695_s27 + $0x74] ss:$8 sps:$4 sm:$0xff]  }
 0x580   : > { %1890 = vmatprep.subr.bf16.mxu1 %v3097_v60  ;;  %v3100_v61 = vld [vmem:[%s3695_s27 + $0x84] ss:$8 sps:$4 sm:$0xff]   ;;  %v1650_v60 = vlaneseq }
 0x581   : > { %1891 = vmatpush1.bf16.msra.mxu1 %v3095_v16 }
 0x582   : > { %1892 = vmatprep.subr.bf16.mxu1 %v3100_v61 }
 0x584   : > { %v1363_v0 = vpop.f32.mrb[24].mxu1 }
 0x585   : > { %v2883_v1 = vpop.f32.mrb[25].mxu1  ;;  %1893 = vmatpush1.bf16.msra.mxu1 %v3098_v62  ;;  %v3964_v62 = vshrl.u32 %v1650_v60, 7 }
 0x586   : > { %v1366_v3 = vpop.f32.mrb[26].mxu1  ;;  %1894 = vmatprep.subr.bf16.mxu1 %v3103_v63  ;;  %v3106_v1 = vld [vmem:[%s3695_s27 + $0xa4] ss:$8 sps:$4 sm:$0xff]  }
 0x587   : > { %v2884_v5 = vpop.f32.mrb[27].mxu1  ;;  %v3109_v3 = vld [vmem:[%s3695_s27 + $0xb4] ss:$8 sps:$4 sm:$0xff]   ;;  %v1652_v63 = vsub.s32 0, %v3964_v62 }
 0x588   : > { %v3112_v5 = vld [vmem:[%s3695_s27 + $0xc4] ss:$8 sps:$4 sm:$0xff]  }
 0x5ef   : > { %v1409_v15 = vpop.f32.mrb[28].mxu1 }
 0x5f0   : > { %v2889_v17 = vpop.f32.mrb[29].mxu1 }
 0x5f1   : > { %v1412_v18 = vpop.f32.mrb[30].mxu1  ;;  %v3124_v17 = vld [vmem:[%s3697_s11 + $0x4] ss:$8 sps:$4 sm:$0xff]  }
 0x5f2   : > { %v2890_v20 = vpop.f32.mrb[31].mxu1  ;;  %v3127_v18 = vld [vmem:[%s3697_s11 + $0x14] ss:$8 sps:$4 sm:$0xff]   ;;  %2125 = vmatprep.subr.bf16.mxu0 %v3124_v17 }
 0x5f3   : > { %v3130_v20 = vld [vmem:[%s3697_s11 + $0x24] ss:$8 sps:$4 sm:$0xff]  }
 0x5f7   : > { %v1455_v21 = vpop.f32.mrb[32].mxu1 }
 0x5f8   : > { %v2981_v22 = vpack.i.bf16 %v1455_v21, %v1409_v15  ;;  %v2895_v23 = vpop.f32.mrb[33].mxu1  ;;  %v3122_v15 = vld [vmem:[%s3697_s11] ss:$8 sps:$4 sm:$0xff]  }
 0x5f9   : > { %v1458_v24 = vpop.f32.mrb[34].mxu1  ;;  %v3128_v21 = vld [vmem:[%s3697_s11 + $0x20] ss:$8 sps:$4 sm:$0xff]   ;;  %v3131_v23 = vld [vmem:[%s3697_s11 + $0x30] ss:$8 sps:$4 sm:$0xff]  }
 0x5fa   : > { %2982 = vrot.lane.b32.xlu1 %v2981_v22, %s3416_s20  ;;  %v2896_v25 = vpop.f32.mrb[35].mxu1  ;;  %v3133_v22 = vld [vmem:[%s3697_s11 + $0x34] ss:$8 sps:$4 sm:$0xff]   ;;  %v3136_v24 = vld [vmem:[%s3697_s11 + $0x44] ss:$8 sps:$4 sm:$0xff]  }
 0x5fb   : > { %v3134_v25 = vld [vmem:[%s3697_s11 + $0x40] ss:$8 sps:$4 sm:$0xff]  }
 0x66c   : > { %v2983_v26 = vpop.permute.xlu1 %2982 }
 0x66d   : > { %v2985_v28 = vunpack.i.h.bf16 %v2983_v26  ;;  %v2984_v29 = vunpack.i.l.bf16 %v2983_v26  ;;  %v3139_v26 = vld [vmem:[%s3697_s11 + $0x54] ss:$8 sps:$4 sm:$0xff]  }
 0x66f   : > { %v1470_v30 = vsel %vm1042_vm4, %v1363_v0, %v2985_v28  ;;  %v1469_v32 = vsel %vm1042_vm4, %v1317_v57, %v2984_v29  ;;  %v3101_v0 = vld [vmem:[%s3695_s27 + $0x90] ss:$8 sps:$4 sm:$0xff]   ;;  %v3142_v29 = vld [vmem:[%s3697_s11 + $0x64] ss:$8 sps:$4 sm:$0xff]  }
 0x670   : > { %v1471_v33 = vpack.c.bf16 %v1470_v30, %v1469_v32  ;;  %1895 = vmatpush1.bf16.msra.mxu1 %v3101_v0  ;;  %v3137_v28 = vld [vmem:[%s3697_s11 + $0x50] ss:$8 sps:$4 sm:$0xff]   ;;  %v3140_v30 = vld [vmem:[%s3697_s11 + $0x60] ss:$8 sps:$4 sm:$0xff]   ;;  %v3145_v32 = vld [vmem:[%s3697_s11 + $0x74] ss:$8 sps:$4 sm:$0xff]  }
 0x671   : > { %1896 = vmatprep.subr.bf16.mxu1 %v3106_v1  ;;  %v3968_v0 = vld [vmem:[%s3708_s29 + $0x8] sm:$0x3f]  ;;  %v3971_v1 = vld [vmem:[%s3708_s29] sm:$0x3f] }
 0x672   : > { %1601 = vmatmul.mubr.bf16.vlgmr.msra.gmra.mrb[4].mxu0 %v1471_v33  ;;  %v3143_v33 = vld [vmem:[%s3697_s11 + $0x70] ss:$8 sps:$4 sm:$0xff]  }
 0x673   : > { %2126 = vmatpush1.bf16.msra.mxu0 %v3122_v15 }
 0x674   : > { %1897 = vmatpush1.bf16.msra.mxu1 %v3104_v2  ;;  %2127 = vmatprep.subr.bf16.mxu0 %v3127_v18 }
 0x675   : > { %1898 = vmatprep.subr.bf16.mxu1 %v3109_v3 }
 0x677   : > { %2128 = vmatpush1.bf16.msra.mxu0 %v3125_v19 }
 0x678   : > { %1899 = vmatpush1.bf16.msra.mxu1 %v3107_v4  ;;  %2129 = vmatprep.subr.bf16.mxu0 %v3130_v20 }
 0x679   : > { %1900 = vmatprep.subr.bf16.mxu1 %v3112_v5  ;;  %v1664_v5 = vsub.s32 1, %v3964_v62 }
 0x67b   : > { %2130 = vmatpush1.bf16.msra.mxu0 %v3128_v21  ;;  %v1669_v15 = vrot.slane %v3968_v0, %v1664_v5 }
 0x67c   : > { %1901 = vmatpush1.bf16.msra.mxu1 %v3110_v6  ;;  %2131 = vmatprep.subr.bf16.mxu0 %v3133_v22 }
 0x67d   : > { %1902 = vmatprep.subr.bf16.mxu1 %v3115_v7  ;;  %v1657_v7 = vrot.slane %v3968_v0, %v1652_v63 }
 0x67f   : > { %2132 = vmatpush1.bf16.msra.mxu0 %v3131_v23 }
 0x680   : > { %1903 = vmatpush1.bf16.msra.mxu1 %v3113_v8  ;;  %2133 = vmatprep.subr.bf16.mxu0 %v3136_v24 }
 0x681   : > { %1904 = vmatprep.subr.bf16.mxu1 %v3118_v9  ;;  %v1653_v9 = vrot.slane %v3971_v1, %v1652_v63 }
 0x683   : > { %2134 = vmatpush1.bf16.msra.mxu0 %v3134_v25 }
 0x684   : > { %1905 = vmatpush1.bf16.msra.mxu1 %v3116_v12  ;;  %2135 = vmatprep.subr.bf16.mxu0 %v3139_v26  ;;  %v3166_v26 = vld [vmem:[%s3697_s11 + $0xe4] ss:$8 sps:$4 sm:$0xff]  }
 0x685   : > { %1906 = vmatprep.subr.bf16.mxu1 %v3121_v13 }
 0x687   : > { %2136 = vmatpush1.bf16.msra.mxu0 %v3137_v28  ;;  %v3164_v28 = vld [vmem:[%s3697_s11 + $0xe0] ss:$8 sps:$4 sm:$0xff]  }
 0x688   : > { %1907 = vmatpush1.bf16.msra.mxu1 %v3119_v14  ;;  %2137 = vmatprep.subr.bf16.mxu0 %v3142_v29  ;;  %v3169_v29 = vld [vmem:[%s3697_s11 + $0xf4] ss:$8 sps:$4 sm:$0xff]  }
 0x68b   : > { %2138 = vmatpush1.bf16.msra.mxu0 %v3140_v30  ;;  %v3167_v30 = vld [vmem:[%s3697_s11 + $0xf0] ss:$8 sps:$4 sm:$0xff]  }
 0x68c   : > { %2139 = vmatprep.subr.bf16.mxu0 %v3145_v32  ;;  %v1710_v32 = vsub.s32 2, %v3964_v62 }
 0x68f   : > { %2140 = vmatpush1.bf16.msra.mxu0 %v3143_v33  ;;  %v1711_v33 = vrot.slane %v3971_v1, %v1710_v32 }
 0x690   : > { %2141 = vmatprep.subr.bf16.mxu0 %v3148_v34  ;;  %v1715_v34 = vrot.slane %v3968_v0, %v1710_v32 }
 0x693   : > { %2142 = vmatpush1.bf16.msra.mxu0 %v3146_v35 }
 0x694   : > { %2143 = vmatprep.subr.bf16.mxu0 %v3151_v36 }
 0x697   : > { %2144 = vmatpush1.bf16.msra.mxu0 %v3149_v27 }
 0x698   : > { %2145 = vmatprep.subr.bf16.mxu0 %v3154_v37 }
 0x69b   : > { %2146 = vmatpush1.bf16.msra.mxu0 %v3152_v38 }
 0x69c   : > { %2147 = vmatprep.subr.bf16.mxu0 %v3157_v31 }
 0x69f   : > { %2148 = vmatpush1.bf16.msra.mxu0 %v3155_v41 }
 0x6a0   : > { %2149 = vmatprep.subr.bf16.mxu0 %v3160_v42 }
 0x6a3   : > { %2150 = vmatpush1.bf16.msra.mxu0 %v3158_v43 }
 0x6a4   : > { %2151 = vmatprep.subr.bf16.mxu0 %v3163_v44 }
 0x6a7   : > { %2152 = vmatpush1.bf16.msra.mxu0 %v3161_v45 }
 0x6a8   : > { %2153 = vmatprep.subr.bf16.mxu0 %v3166_v26  ;;  %v2224_v26 = vsub.s32 5, %v3964_v62 }
 0x6ab   : > { %2154 = vmatpush1.bf16.msra.mxu0 %v3164_v28 }
 0x6ac   : > { %2155 = vmatprep.subr.bf16.mxu0 %v3169_v29 }
 0x6af   : > { %2156 = vmatpush1.bf16.msra.mxu0 %v3167_v30 }
 0x745   : > { %v1602_v48 = vpop.f32.mrb[4].mxu0 }
 0x746   : > { %v3895_v49 = vadd.f32 %v1602_v48, %v3789_v10  ;;  %v1604_v50 = vpop.f32.mrb[5].mxu0 }
 0x747   : > { %v3898_v51 = vadd.f32 %v1604_v50, %v3751_v39  ;;  %v1606_v52 = vpop.f32.mrb[6].mxu0 }
 0x748   : > { %v3901_v53 = vadd.f32 %v1606_v52, %v3791_v11  ;;  %v1608_v54 = vpop.f32.mrb[7].mxu0  ;;  %v1620_v10 = vmul.f32 %v3895_v49, %v3895_v49 }
 0x749   : > { %v3904_v55 = vadd.f32 %v1608_v54, %v3753_v40  ;;  %v1611_v56 = vadd.f32 %v3898_v51, %v3895_v49  ;;  %v1621_v39 = vmul.f32 %v3898_v51, %v3898_v51 }
 0x74a   : > { %v1622_v57 = vmul.f32 %v3901_v53, %v3901_v53 }
 0x74b   : > { %1612 = vadd.xlane.f32.xlu0 %v1611_v56  ;;  %v1614_v11 = vadd.f32 %v3904_v55, %v3901_v53  ;;  %v1624_v40 = vadd.f32 %v1621_v39, %v1620_v10  ;;  %v1623_v58 = vmul.f32 %v3904_v55, %v3904_v55 }
 0x74d   : > { %1615 = vadd.xlane.f32.xlu1 %v1614_v11  ;;  %v1627_v59 = vadd.f32 %v1623_v58, %v1622_v57 }
 0x74f   : > { %1625 = vadd.xlane.f32.xlu0 %v1624_v40 }
 0x753   : > { %1628 = vadd.xlane.f32.xlu0 %v1627_v59 }
 0x7d8   : > { %v1613_v46 = vpop.xlane.xlu0 %1612 }
 0x7d9   : > { %v1618_v47 = vmul.f32 0.00390625, %v1613_v46 }
 0x7da   : > { %v1616_v48 = vpop.xlane.xlu1 %1615 }
 0x7db   : > { %v1619_v52 = vmul.f32 0.00390625, %v1616_v48  ;;  %v1632_v54 = vmul.f32 %v1618_v47, %v1618_v47  ;;  %v1638_v2 = vsub.f32 %v3895_v49, %v1618_v47  ;;  %v1639_v3 = vsub.f32 %v3898_v51, %v1618_v47 }
 0x7dc   : > { %v1626_v50 = vpop.xlane.xlu0 %1625  ;;  %v1665_v49 = vrot.slane %v3971_v1, %v1664_v5 }
 0x7dd   : > { %v1630_v56 = vmul.f32 0.00390625, %v1626_v50  ;;  %v1633_v40 = vmul.f32 %v1619_v52, %v1619_v52  ;;  %v1640_v12 = vsub.f32 %v3901_v53, %v1619_v52  ;;  %v1641_v13 = vsub.f32 %v3904_v55, %v1619_v52 }
 0x7de   : > { %v1959_v50 = vsub.s32 3, %v3964_v62 }
 0x7df   : > { %v1634_v10 = vsub.f32 %v1630_v56, %v1632_v54 }
 0x7e0   : > { %v1629_v39 = vpop.xlane.xlu0 %1628  ;;  %v1960_v52 = vrot.slane %v3971_v1, %v1959_v50  ;;  %v1964_v54 = vrot.slane %v3968_v0, %v1959_v50 }
 0x7e1   : > { %v1636_v11 = vmax.f32 %v1634_v10, 0.0  ;;  %v1631_v57 = vmul.f32 0.00390625, %v1629_v39 }
 0x7e3   : > { %v1642_v58 = vadd.f32 1e-05, %v1636_v11  ;;  %v1635_v59 = vsub.f32 %v1631_v57, %v1633_v40 }
 0x7e5   : > { %3186 = vrsqrt.f32 %v1642_v58  ;;  %v1637_v16 = vmax.f32 %v1635_v59, 0.0 }
 0x7e7   : > { %v1643_v61 = vadd.f32 1e-05, %v1637_v16 }
 0x7e9   : > { %3188 = vrsqrt.f32 %v1643_v61 }
 0x7ef   : > { %v3187_v4 = vpop.eup %3186 }
 0x7f0   : > { %v1647_v6 = vmul.f32 %v3187_v4, %v1639_v3  ;;  %v1646_v8 = vmul.f32 %v3187_v4, %v1638_v2 }
 0x7f2   : > { %v1659_v17 = vmul.f32 %v1657_v7, %v1647_v6  ;;  %v1658_v19 = vmul.f32 %v1653_v9, %v1646_v8 }
 0x7f3   : > { %v3189_v14 = vpop.eup %3188 }
 0x7f4   : > { %v1649_v51 = vmul.f32 %v3189_v14, %v1641_v13  ;;  %v1648_v18 = vmul.f32 %v3189_v14, %v1640_v12  ;;  %v1671_v22 = vadd.f32 %v1669_v15, %v1659_v17  ;;  %v1670_v53 = vadd.f32 %v1665_v49, %v1658_v19 }
 0x7f6   : > { %v1661_v20 = vmul.f32 %v1657_v7, %v1649_v51  ;;  %v1660_v21 = vmul.f32 %v1653_v9, %v1648_v18 }
 0x7f8   : > { %v1673_v23 = vadd.f32 %v1669_v15, %v1661_v20  ;;  %v1672_v24 = vadd.f32 %v1665_v49, %v1660_v21 }
 0x7fa   : > { %v1675_v55 = vpack.c.bf16 %v1673_v23, %v1671_v22  ;;  %v1674_v25 = vpack.c.bf16 %v1672_v24, %v1670_v53 }
 0x7fc   : > { %1908 = vmatprep.mubr.bf16.mxu1 %v1675_v55 }
 0x7fd   : > { %1909 = vmatmul.mubr.bf16.vlgmr.msra.gmra.mrb[36].mxu1 %v1674_v25  ;;  %v2212_v25 = vsub.s32 4, %v3964_v62 }
 0x7ff   : > { %v2213_v30 = vrot.slane %v3971_v1, %v2212_v25  ;;  %v2217_v32 = vrot.slane %v3968_v0, %v2212_v25 }
 0x8d0   : > { %v1910_v35 = vpop.f32.mrb[36].mxu1 }
 0x8d1   : > { %v1911_v36 = vadd.f32 %v1910_v35, %v1711_v33  ;;  %v1912_v27 = vpop.f32.mrb[37].mxu1  ;;  %v2229_v35 = vrot.slane %v3968_v0, %v2224_v26  ;;  %v3194_v0 = vld [vmem:[%s4096_s8 + $0x40] sm:$0xff] (!%p2763_p5)  }
 0x8d2   : > { %v1913_v37 = vadd.f32 %v1912_v27, %v1715_v34  ;;  %v1914_v38 = vpop.f32.mrb[38].mxu1  ;;  %2827 = vmatprep.subr.bf16.mxu0 (!%p2763_p5), %v3194_v0 }
 0x8d3   : > { %v1915_v31 = vadd.f32 %v1914_v38, %v1711_v33  ;;  %v1916_v41 = vpop.f32.mrb[39].mxu1  ;;  %v1919_v43 = vmax.f32 %v1911_v36, 0.0 }
 0x8d4   : > { %v1917_v42 = vadd.f32 %v1916_v41, %v1715_v34  ;;  %v1920_v45 = vmax.f32 %v1913_v37, 0.0  ;;  %v2225_v34 = vrot.slane %v3971_v1, %v2224_v26 }
 0x8d5   : > { %v1921_v44 = vmax.f32 %v1915_v31, 0.0 }
 0x8d6   : > { %v1922_v46 = vmax.f32 %v1917_v42, 0.0 }
 0x8d7   : > { %v1923_v47 = vpack.c.bf16 %v1921_v44, %v1919_v43 }
 0x8d8   : > { %v1924_v48 = vpack.c.bf16 %v1922_v46, %v1920_v45 }
 0x8da   : > { %2157 = vmatprep.mubr.bf16.mxu0 %v1924_v48 }
 0x8db   : > { %2158 = vmatmul.mubr.bf16.vlgmr.msra.gmra.mrb[8].mxu0 %v1923_v47 }
 0x9ae   : > { %v2159_v56 = vpop.f32.mrb[8].mxu0 }
 0x9af   : > { %v2160_v10 = vadd.f32 %v2159_v56, %v1960_v52  ;;  %v2161_v39 = vpop.f32.mrb[9].mxu0  ;;  %v3196_v56 = vld [vmem:[%s4096_s8 + $0x48] sm:$0xff] (!%p2763_p5)  }
 0x9b0   : > { %v2162_v11 = vadd.f32 %v2161_v39, %v1964_v54  ;;  %v2163_v40 = vpop.f32.mrb[10].mxu0  ;;  %v3197_v39 = vld [vmem:[%s4096_s8 + $0x8] sm:$0xff] (!%p2763_p5)  }
 0x9b1   : > { %v2168_v57 = vadd.f32 %v2160_v10, %v1670_v53  ;;  %v2164_v58 = vadd.f32 %v2163_v40, %v1960_v52  ;;  %v2165_v59 = vpop.f32.mrb[11].mxu0  ;;  %v3195_v52 = vld [vmem:[%s4096_s8] sm:$0xff] (!%p2763_p5)  }
 0x9b2   : > { %v2169_v60 = vadd.f32 %v2162_v11, %v1671_v22  ;;  %v2166_v16 = vadd.f32 %v2165_v59, %v1964_v54  ;;  %2828 = vmatpush3.bf16.msra.mxu0 (!%p2763_p5), %v3195_v52 }
 0x9b3   : > { %v2170_v61 = vadd.f32 %v2164_v58, %v1672_v24  ;;  %v2180_v3 = vmul.f32 %v2168_v57, %v2168_v57  ;;  %2829 = vmatprep.subr.bf16.mxu0 (!%p2763_p5), %v3196_v56 }
 0x9b4   : > { %v2171_v63 = vadd.f32 %v2166_v16, %v1673_v23  ;;  %v2172_v2 = vadd.f32 %v2169_v60, %v2168_v57  ;;  %v2181_v4 = vmul.f32 %v2169_v60, %v2169_v60 }
 0x9b5   : > { %v2182_v6 = vmul.f32 %v2170_v61, %v2170_v61 }
 0x9b6   : > { %2173 = vadd.xlane.f32.xlu1 %v2172_v2  ;;  %v2175_v5 = vadd.f32 %v2171_v63, %v2170_v61  ;;  %v2183_v7 = vmul.f32 %v2171_v63, %v2171_v63  ;;  %v2184_v8 = vadd.f32 %v2181_v4, %v2180_v3  ;;  %2830 = vmatpush3.bf16.msra.mxu0 (!%p2763_p5), %v3197_v39  ;;  %v3200_v4 = vld [vmem:[%s4096_s8 + $0x58] sm:$0xff] (!%p2763_p5)  }
 0x9b8   : > { %2176 = vadd.xlane.f32.xlu0 %v2175_v5  ;;  %v2187_v9 = vadd.f32 %v2183_v7, %v2182_v6 }
 0x9ba   : > { %2185 = vadd.xlane.f32.xlu1 %v2184_v8 }
 0x9bc   : > { %2188 = vadd.xlane.f32.xlu0 %v2187_v9 }
 0xa43   : > { %v2174_v12 = vpop.xlane.xlu1 %2173 }
 0xa44   : > { %v2178_v13 = vmul.f32 0.00390625, %v2174_v12 }
 0xa45   : > { %v2177_v14 = vpop.xlane.xlu0 %2176 }
 0xa46   : > { %v2179_v15 = vmul.f32 0.00390625, %v2177_v14  ;;  %v2192_v51 = vmul.f32 %v2178_v13, %v2178_v13  ;;  %v2198_v28 = vsub.f32 %v2168_v57, %v2178_v13  ;;  %v2199_v29 = vsub.f32 %v2169_v60, %v2178_v13  ;;  %v3198_v57 = vld [vmem:[%s4096_s8 + $0x50] sm:$0xff] (!%p2763_p5)   ;;  %v3201_v13 = vld [vmem:[%s4096_s8 + $0x18] sm:$0xff] (!%p2763_p5)  }
 0xa47   : > { %v2186_v49 = vpop.xlane.xlu1 %2185  ;;  %2831 = vmatprep.subr.bf16.mxu0 (!%p2763_p5), %v3198_v57 }
 0xa48   : > { %v2190_v17 = vmul.f32 0.00390625, %v2186_v49  ;;  %v2193_v20 = vmul.f32 %v2179_v15, %v2179_v15  ;;  %v2200_v36 = vsub.f32 %v2170_v61, %v2179_v15  ;;  %v2201_v27 = vsub.f32 %v2171_v63, %v2179_v15  ;;  %v3199_v63 = vld [vmem:[%s4096_s8 + $0x10] sm:$0xff] (!%p2763_p5)   ;;  %v3202_v49 = vld [vmem:[%s4096_s8 + $0x60] sm:$0xff] (!%p2763_p5)  }
 0xa49   : > { %v2189_v18 = vpop.xlane.xlu0 %2188  ;;  %2832 = vmatpush3.bf16.msra.mxu0 (!%p2763_p5), %v3199_v63 }
 0xa4a   : > { %v2194_v19 = vsub.f32 %v2190_v17, %v2192_v51  ;;  %v2191_v21 = vmul.f32 0.00390625, %v2189_v18  ;;  %2833 = vmatprep.subr.bf16.mxu0 (!%p2763_p5), %v3200_v4 }
 0xa4c   : > { %v2196_v22 = vmax.f32 %v2194_v19, 0.0  ;;  %v2195_v23 = vsub.f32 %v2191_v21, %v2193_v20 }
 0xa4d   : > { %2834 = vmatpush3.bf16.msra.mxu0 (!%p2763_p5), %v3201_v13 }
 0xa4e   : > { %v2202_v53 = vadd.f32 1e-05, %v2196_v22  ;;  %v2197_v24 = vmax.f32 %v2195_v23, 0.0  ;;  %v3203_v22 = vld [vmem:[%s4096_s8 + $0x20] sm:$0xff] (!%p2763_p5)   ;;  %2835 = vmatprep.subr.bf16.mxu0 (!%p2763_p5), %v3202_v49 }
 0xa50   : > { %3190 = vrsqrt.f32 %v2202_v53  ;;  %v2203_v55 = vadd.f32 1e-05, %v2197_v24  ;;  %v3204_v24 = vld [vmem:[%s4096_s8 + $0x68] sm:$0xff] (!%p2763_p5)  }
 0xa51   : > { %2836 = vmatpush3.bf16.msra.mxu0 (!%p2763_p5), %v3203_v22 }
 0xa52   : > { %3192 = vrsqrt.f32 %v2203_v55  ;;  %2837 = vmatprep.subr.bf16.mxu0 (!%p2763_p5), %v3204_v24 }
 0xa5a   : > { %v3191_v33 = vpop.eup %3190 }
 0xa5b   : > { %v2206_v37 = vmul.f32 %v3191_v33, %v2198_v28  ;;  %v2207_v38 = vmul.f32 %v3191_v33, %v2199_v29  ;;  %v3205_v29 = vld [vmem:[%s4096_s8 + $0x28] sm:$0xff] (!%p2763_p5)   ;;  %v3206_v33 = vld [vmem:[%s4096_s8 + $0x70] sm:$0xff] (!%p2763_p5)  }
 0xa5c   : > { %v3193_v31 = vpop.eup %3192  ;;  %2838 = vmatpush3.bf16.msra.mxu0 (!%p2763_p5), %v3205_v29 }
 0xa5d   : > { %v2218_v41 = vmul.f32 %v2213_v30, %v2206_v37  ;;  %v2219_v42 = vmul.f32 %v2217_v32, %v2207_v38  ;;  %v2208_v43 = vmul.f32 %v3193_v31, %v2200_v36  ;;  %v2209_v62 = vmul.f32 %v3193_v31, %v2201_v27  ;;  %2241 = sbr.rel (%p2763_p5) target bundleno = 2899 (0xb53), region = 84  ;;  %v3207_v36 = vld [vmem:[%s4096_s8 + $0x30] sm:$0xff] (!%p2763_p5)   ;;  %2839 = vmatprep.subr.bf16.mxu0 (!%p2763_p5), %v3206_v33  ;;  %v3208_v38 = vld [vmem:[%s4096_s8 + $0x78] sm:$0xff] (!%p2763_p5)  }
 0xa5e   : > { %v3209_v31 = vld [vmem:[%s4096_s8 + $0x38] sm:$0xff] (!%p2763_p5)  }
 0xa5f   : > { %v2230_v44 = vadd.f32 %v2225_v34, %v2218_v41  ;;  %v2231_v45 = vadd.f32 %v2229_v35, %v2219_v42  ;;  %v2220_v46 = vmul.f32 %v2213_v30, %v2208_v43  ;;  %v2221_v47 = vmul.f32 %v2217_v32, %v2209_v62  ;;  %v2764_v62 = vld [vmem:[%s4097_s9] ss:$0 sm:$0xff] (!%p2763_p5) }
 0xa60   : > { %2840 = vmatpush3.bf16.msra.mxu0 (!%p2763_p5), %v3207_v36 }
 0xa61   : > { %2234 = vst [vmem:[#allocation2] sm:$0xff] %v2230_v44  ;;  %2235 = vst [vmem:[#allocation2 + $0x8] sm:$0xff] %v2231_v45  ;;  %v2232_v48 = vadd.f32 %v2225_v34, %v2220_v46  ;;  %v2233_v50 = vadd.f32 %v2229_v35, %v2221_v47  ;;  %v2248_v1 = vrot.slane (!%p2763_p5), %v2231_v45, 4  ;;  %v2242_v40 = vrot.slane (!%p2763_p5), %v2230_v44, 4  ;;  %2841 = vmatprep.subr.bf16.mxu0 (!%p2763_p5), %v3208_v38 }
 0xa63   : > { %2236 = vst [vmem:[#allocation2 + $0x10] sm:$0xff] %v2232_v48  ;;  %2237 = vst [vmem:[#allocation2 + $0x18] sm:$0xff] %v2233_v50  ;;  %v2260_v54 = vrot.slane (!%p2763_p5), %v2233_v50, 4  ;;  %v2249_v10 = vadd.f32 (!%p2763_p5), %v2248_v1, %v2231_v45  ;;  %v2243_v60 = vadd.f32 (!%p2763_p5), %v2242_v40, %v2230_v44  ;;  %v2254_v61 = vrot.slane (!%p2763_p5), %v2232_v48, 4 }
 0xa64   : > { %2842 = vmatpush3.bf16.msra.mxu0 %v3209_v31 }
 0xa65   : > { %v2261_v11 = vadd.f32 %v2260_v54, %v2233_v50  ;;  %v2250_v58 = vrot.slane %v2249_v10, 2  ;;  %v2244_v3 = vrot.slane %v2243_v60, 2  ;;  %v2255_v6 = vadd.f32 %v2254_v61, %v2232_v48 }
 0xa67   : > { %v2262_v59 = vrot.slane %v2261_v11, 2  ;;  %v2251_v16 = vadd.f32 %v2250_v58, %v2249_v10  ;;  %v2245_v8 = vadd.f32 %v2244_v3, %v2243_v60  ;;  %v2256_v12 = vrot.slane %v2255_v6, 2 }
 0xa69   : > { %v2263_v2 = vadd.f32 %v2262_v59, %v2261_v11  ;;  %v2252_v5 = vrot.slane %v2251_v16, 1  ;;  %v2246_v15 = vrot.slane %v2245_v8, 1  ;;  %v2257_v17 = vadd.f32 %v2256_v12, %v2255_v6 }
 0xa6b   : > { %v2264_v7 = vrot.slane %v2263_v2, 1  ;;  %v2253_v9 = vadd.f32 %v2252_v5, %v2251_v16  ;;  %v2247_v19 = vadd.f32 %v2246_v15, %v2245_v8  ;;  %v2258_v21 = vrot.slane %v2257_v17, 1 }
 0xa6d   : > { %v2265_v14 = vadd.f32 %v2264_v7, %v2263_v2  ;;  %v2268_v51 = vmul.f32 0.125, %v2253_v9  ;;  %v2267_v53 = vmul.f32 0.125, %v2247_v19  ;;  %v2259_v25 = vadd.f32 %v2258_v21, %v2257_v17 }
 0xa6f   : > { %v2270_v18 = vmul.f32 0.125, %v2265_v14  ;;  %v2272_v20 = vpack.c.bf16 %v2268_v51, %v2268_v51  ;;  %v2269_v28 = vmul.f32 0.125, %v2259_v25  ;;  %v2271_v32 = vpack.c.bf16 %v2267_v53, %v2267_v53 }
 0xa71   : > { %v2274_v23 = vpack.c.bf16 %v2270_v18, %v2270_v18  ;;  %v2319_v55 = vunpack.c.l.b16 %v2272_v20  ;;  %v2273_v35 = vpack.c.bf16 %v2269_v28, %v2269_v28  ;;  %v2318_v27 = vunpack.c.l.b16 %v2271_v32 }
 0xa73   : > { %v2321_v26 = vunpack.c.l.b16 %v2274_v23  ;;  %v2320_v37 = vunpack.c.l.b16 %v2273_v35 }
 0xa75   : > { %v2324_v30 = vsel %vm2322_vm7, %v2321_v26, %v2319_v55  ;;  %v2323_v41 = vsel %vm2322_vm7, %v2320_v37, %v2318_v27 }
 0xa76   : > { %v2326_v34 = vpack.c.b16 %v2324_v30, %v2324_v30  ;;  %v2325_v42 = vpack.c.b16 %v2323_v41, %v2323_v41 }
 0xa78   : > { %2457 = vmatprep.mubr.bf16.mxu0 %v2326_v34 }
 0xa79   : > { %2458 = vmatmul.mubr.bf16.vlgmr.msra.gmra.mrb[0].mxu0 %v2325_v42 }
 0xb4c   : > { %v2843_v43 = vpop.f32.mrb[0].mxu0 }
 0xb4d   : > { %v2844_v44 = vpop.f32.mrb[1].mxu0 }
 0xb4e   : > { %v2845_v45 = vadd.f32 %v2844_v44, %v2843_v43  ;;  %v2846_v46 = vpop.f32.mrb[2].mxu0 }
 0xb4f   : > { %v2847_v47 = vpop.f32.mrb[3].mxu0 }
 0xb50   : > { %v2460_v48 = vadd.f32 %v2845_v45, %v2764_v62 }
 0xb52   : > { %2466 = vst.msk [vmem:[#allocation11] sm:$0x3] %vm2465_vm8, %v2460_v48 }
 0xb53 PF: > { %p2926_p6 = scmp.eq.s32.totalorder %s3493_s17, 1  ;;  %s3418_s28 = smov [#allocation11]  }
 0xb54   : > { %s2474_s26 = sshll.u32 %s3418_s28, 4  ;;  %s2475_s26 = int_to_ptr.vmem [resolvable:$true] %s2474_s26 }
 0xb55   : > { %s3330_s12 = scalar_lea.vmem %s2475_s26, 32  ;;  %p3337_p13 = scmp.lt.s32.totalorder %s2475_s26, %s2475_s26 }
 0xb56   : > { %p3331_p1 = scmp.ne.s32.totalorder %s2475_s26, %s3330_s12  ;;  %p3338_p9 = scmp.lt.s32.totalorder %s3330_s12, %s3330_s12 }
 0xb58   : > { %p3332_p4 = pnand %p3331_p1, %p2926_p6  ;;  %p3339_p0 = por %p3338_p9, %p3337_p13 }
 0xb5a   : > { %p3333_p11 = pneg %p3332_p4 }
 0xb5c   : > { %p3340_p12 = pnand %p3339_p0, %p3333_p11 }
 0xb5e   : > { %3343 = shalt.err (!%p3340_p12)
}
 0xb5f   : > { %s3344_s20 = scalar_lea.hbm %s4098_s10, 32 }
 0xb60   : > { %p3345_p2 = scmp.ne.s32.totalorder %s4098_s10, %s3344_s20  ;;  %p3350_p8 = scmp.lt.u32.totalorder %s3344_s20, %s4098_s10 }
 0xb62   : > { %p3346_p10 = pnand %p3345_p2, %p2926_p6 }
 0xb64   : > { %p3347_p7 = pneg %p3346_p10 }
 0xb66   : > { %p3352_p3 = pnand %p3350_p8, %p3347_p7 }
 0xb68   : > { %3355 = shalt.err (!%p3352_p3)
}
 0xb69   : > { %2909 = dma.vmem_to_hbm [thread:$0]  (%p2926_p6), %s2475_s26, 32, %s4098_s10, [#allocation5]  }
 0xb6a   : > { %3385 = dma.done.wait (%p2926_p6), [#allocation5], 32  }
 0xb6b   : > { %3387 = vsyncadd (%p2926_p6), [#allocation5], 4294967264 }
 0xb6c PF: > { %s4122_s16 = sld [smem:[#allocation17_spill]]  ;;  %s4123_s3 = sld [smem:[#allocation16_spill]] }
 0xb6d   : > { %s4124_s15 = sld [smem:[#allocation18_spill]]  ;;  %s4125_s13 = smov %s3394_s14 }
 0xb72   : > { %p27_p5 = scmp.ge.s32.totalorder %s4122_s16, 4   ;;  %s4126_s14 = smov %s4123_s3 }
 0xb74   :  { %29 = sbr.rel (!%p27_p5) target bundleno = 11 (0xb), region = 145 }
 0xb7b   :  { %2487 = vsyncpa [#allocation4], 1 }
 0xb7c   :  { %2489 = vsyncpa [#allocation4 + $0x1], 1 }
 0xb7d   :  { %2490 = vsyncpa [#allocation7], 1 }
 0xb7e   :  { %2492 = vsyncpa [#allocation7 + $0x1], 1 }
 0xb7f   :  { %2493 = vsyncpa [#allocation10], 1 }
 0xb80   :  { %2495 = vsyncpa [#allocation10 + $0x1], 1 }
 0xb81   :  { %2496 = vsyncpa [#allocation5], 1 }
 0xb82   :  { %2498 = vsyncpa [#allocation5 + $0x1], 1 }

</bundles_post_ra>
